<compile_context>
chip_gen: v5e
topology: v5e:2x2
jax: 0.10.0
libtpu: 0.0.40
codegen_flags: <defaults>
</compile_context>

<pallas_src>
import functools
import re

import jax
import jax.numpy as jnp
from jax.experimental import pallas as pl
from jax.experimental.pallas import tpu as pltpu

_LANES = 128


def _round_up(n, m):
    return ((n + m - 1) // m) * m


def _tpu_generation_info():
    """Returns (tensorcores a 'parallel' grid axis can use, has bf16 VPU, vmem cap bytes)."""
    devs = jax.devices()
    kind = (getattr(devs[0], "device_kind", "") or "").lower() if devs else ""
    m = re.search(r"(\d+)", kind)
    gen = int(m.group(1)) if m else 0
    is_lite = ("lite" in kind) or (re.search(r"v\d+e", kind) is not None)
    if gen >= 7:
        n_tc = 2                      # v7x: 2 TensorCores per chip
    elif gen in (4, 5) and not is_lite:
        n_tc = 2                      # v4 / v5p megacore
    else:
        n_tc = 1                      # v2/v3/v5e/v6e: the grid is a serial loop
    has_bf16_vpu = gen >= 6           # v6e/v7x only; v5e VPU is f32
    if gen >= 7:
        vmem_cap = 32 * 1024 * 1024   # 64 MiB physical -> stay conservative
    elif gen >= 4:
        vmem_cap = 100 * 1024 * 1024  # 128 MiB physical
    else:
        vmem_cap = 16 * 1024 * 1024
    return n_tc, has_bf16_vpu, vmem_cap


def _pick_batch_tile(batch, n_tc, fits):
    """Prefer exactly n_tc equal steps on multi-TC chips, otherwise a single
    full-batch step; only split further if the tile would not fit VMEM."""
    candidates = []
    if n_tc > 1 and batch % n_tc == 0 and (batch // n_tc) % 8 == 0:
        candidates.append(batch // n_tc)
    candidates.append(batch)
    t = batch
    while t % 2 == 0 and t > 8:
        t //= 2
        if t % 8 == 0 and t not in candidates:
            candidates.append(t)
    for tb in candidates:
        if fits(tb):
            return tb
    return candidates[-1]


def _mlp_softmax_kernel(n_hidden, compute_dtype, relu_low_precision,
                        x_ref, mask_ref, *refs):
    """Fused MLP -> masked softmax over one batch tile.

    refs = (W_0, b_0, ..., W_{n-1}, b_{n-1}, W_last, out_ref).  Weights arrive
    lane-padded; mask_ref is a (1, padded_action_dim) additive mask (0 on real
    columns, -inf on padding) so padded columns softmax to exactly 0.
    """
    out_ref = refs[-1]
    params = refs[:-1]

    h = x_ref[...].astype(compute_dtype)
    for i in range(n_hidden):
        w = params[2 * i][...]
        b = params[2 * i + 1][...].astype(jnp.float32)            # (1, H) broadcast
        z = jnp.dot(h, w, preferred_element_type=jnp.float32) + b  # f32 accumulate
        if relu_low_precision and compute_dtype != jnp.float32:
            # ReLU commutes with rounding -> identical values, half the VPU traffic.
            h = jnp.maximum(z.astype(compute_dtype), 0.0)
        else:
            h = jnp.maximum(z, 0.0).astype(compute_dtype)          # f32 VPU (v5e-safe)

    w_last = params[2 * n_hidden][...]
    logits = jnp.dot(h, w_last, preferred_element_type=jnp.float32)
    logits = logits + mask_ref[...]                                # pad cols -> -inf

    m = jnp.max(logits, axis=-1, keepdims=True)
    e = jnp.exp(logits - m)
    denom = jnp.sum(e, axis=-1, keepdims=True)
    out_ref[...] = (e / denom).astype(out_ref.dtype)               # exact softmax


@functools.partial(jax.jit, static_argnames=("batch_tile", "param_dtype"))
def action_value_forward(x, hidden_weights, hidden_biases, w_last, *,
                         batch_tile=None, param_dtype=jnp.bfloat16):
    """ActionValue forward with one fused Pallas kernel.

    x:              (B, state_dim) float32
    hidden_weights: list of (in_i, out_i) arrays
    hidden_biases:  list of (1, out_i) arrays
    w_last:         (hidden_sizes[-1], action_dim) array
    returns:        (B, action_dim) float32, rows sum to 1
    """
    B, state_dim = x.shape
    action_dim = w_last.shape[1]
    n_hidden = len(hidden_weights)

    n_tc, has_bf16_vpu, vmem_cap = _tpu_generation_info()

    if param_dtype is None:
        compute_dtype = hidden_weights[0].dtype
    else:
        hidden_weights = [w.astype(param_dtype) for w in hidden_weights]
        hidden_biases = [b.astype(param_dtype) for b in hidden_biases]
        w_last = w_last.astype(param_dtype)
        compute_dtype = param_dtype

    # Lane-pad every hidden width and the action dim to 128.  Exact: padded
    # bias entries are 0 so padded activations are ReLU(0)=0, padded weight
    # rows are 0 so they contribute nothing, padded logits are masked below.
    padded_h = [_round_up(w.shape[1], _LANES) for w in hidden_weights]
    padded_ad = _round_up(action_dim, _LANES)

    param_args = []
    in_dim = state_dim
    for w, b, hp in zip(hidden_weights, hidden_biases, padded_h):
        wp = jnp.pad(w, ((0, in_dim - w.shape[0]), (0, hp - w.shape[1])))
        bp = jnp.pad(b, ((0, 0), (0, hp - b.shape[1])))
        param_args += [wp, bp]
        in_dim = hp
    w_last_p = jnp.pad(w_last, ((0, in_dim - w_last.shape[0]),
                                (0, padded_ad - w_last.shape[1])))
    param_args.append(w_last_p)

    # Precomputed additive softmax mask (review item: no per-step iota/where).
    mask = jnp.zeros((1, padded_ad), jnp.float32).at[:, action_dim:].set(-jnp.inf)

    # VMEM need per grid step: resident (double-buffered) params + pipelined
    # x/out tiles + a few live f32 activation tiles.
    param_bytes = sum(int(p.size) * p.dtype.itemsize for p in param_args)
    max_w = max([_round_up(state_dim, _LANES), padded_ad] + padded_h)

    def vmem_need(tb):
        act = 4 * tb * max_w * 4
        io = 2 * tb * (state_dim * x.dtype.itemsize + padded_ad * 4)
        return 2 * param_bytes + act + io + int(mask.size) * 4

    if batch_tile is None:
        tb = _pick_batch_tile(B, n_tc, lambda t: vmem_need(t) <= 0.7 * vmem_cap)
    else:
        tb = batch_tile
    assert B % tb == 0, f"batch {B} must be divisible by batch_tile {tb}"

    vmem_limit = min(max(int(1.25 * vmem_need(tb)), 8 * 1024 * 1024), vmem_cap)

    in_specs = [pl.BlockSpec((tb, state_dim), lambda i: (i, 0)),   # x tile
                pl.BlockSpec((1, padded_ad), lambda i: (0, 0))]    # softmax mask
    for p in param_args:                                           # resident params
        in_specs.append(pl.BlockSpec(p.shape, lambda i: (0, 0)))
    out_specs = pl.BlockSpec((tb, padded_ad), lambda i: (i, 0))    # lane-dense store

    kernel = functools.partial(
        _mlp_softmax_kernel, n_hidden, compute_dtype,
        bool(has_bf16_vpu and compute_dtype == jnp.bfloat16))

    out = pl.pallas_call(
        kernel,
        out_shape=jax.ShapeDtypeStruct((B, padded_ad), jnp.float32),
        grid=(B // tb,),
        in_specs=in_specs,
        out_specs=out_specs,
        compiler_params=pltpu.CompilerParams(
            dimension_semantics=("parallel",),
            vmem_limit_bytes=vmem_limit),
    )(x, mask, *param_args)

    # Padded -> real action columns.  The whole forward is one jit, so this
    # slice fuses with whatever consumes the result (review item).
    return out[:, :action_dim] if padded_ad != action_dim else out


def init_params(key, state_dim, hidden_sizes, action_dim):
    """Deterministic synthetic init mimicking nn.Linear's U(-1/sqrt(fan_in), ...)."""
    hidden_weights, hidden_biases = [], []
    in_dim = state_dim
    for h in hidden_sizes:
        key, kw, kb = jax.random.split(key, 3)
        bound = 1.0 / jnp.sqrt(in_dim)
        hidden_weights.append(
            jax.random.uniform(kw, (in_dim, h), jnp.float32, -bound, bound))
        hidden_biases.append(
            jax.random.uniform(kb, (1, h), jnp.float32, -bound, bound))
        in_dim = h
    key, kw = jax.random.split(key)
    bound = 1.0 / jnp.sqrt(in_dim)
    w_last = jax.random.uniform(kw, (in_dim, action_dim), jnp.float32, -bound, bound)
    return hidden_weights, hidden_biases, w_last


if __name__ == "__main__":
    # Shapes consistent with the module: x (batch, state_dim) -> (batch, action_dim).
    batch, state_dim, action_dim = 256, 32, 16
    hidden_sizes = [64, 32]

    key = jax.random.PRNGKey(0)
    key, kx = jax.random.split(key)
    x = jax.random.normal(kx, (batch, state_dim), jnp.float32)

    hidden_weights, hidden_biases, w_last = init_params(
        key, state_dim, hidden_sizes, action_dim)

    def ref_forward(xv, hws, hbs, wl, dtype):
        # Mirrors the kernel's cast points so the comparison isolates
        # kernel-vs-XLA differences rather than the quantization choice.
        def cast(a):
            return a.astype(dtype).astype(jnp.float32)
        h = xv.astype(jnp.float32)
        for w, b in zip(hws, hbs):
            h = jnp.maximum(jnp.dot(cast(h), cast(w)) + cast(b), 0.0)
        logits = jnp.dot(cast(h), cast(wl))
        return jax.nn.softmax(logits, axis=1)

    # --- default path: bf16 params, f32 accumulation / softmax ---
    out_bf16 = jax.block_until_ready(
        action_value_forward(x, hidden_weights, hidden_biases, w_last))
    ref_bf16 = ref_forward(x, hidden_weights, hidden_biases, w_last, jnp.bfloat16)
    assert out_bf16.shape == (batch, action_dim)
    assert jnp.allclose(out_bf16, ref_bf16, atol=2e-2, rtol=2e-2)
    assert jnp.allclose(jnp.sum(out_bf16, axis=1), 1.0, atol=1e-3)

    # --- full f32 parameter path ---
    out_f32 = jax.block_until_ready(
        action_value_forward(x, hidden_weights, hidden_biases, w_last,
                             param_dtype=jnp.float32))
    ref_f32 = ref_forward(x, hidden_weights, hidden_biases, w_last, jnp.float32)
    assert out_f32.shape == (batch, action_dim)
    assert jnp.allclose(out_f32, ref_f32, atol=2e-3, rtol=2e-3)
    assert jnp.allclose(jnp.sum(out_f32, axis=1), 1.0, atol=1e-3)

    print("KERNEL_OK")
</pallas_src>

<mosaic_0001>
module attributes {stable_mosaic.version = 11 : i64} {
  func.func @_mlp_softmax_kernel(%arg0: i32, %arg1: memref<256x32xf32, #tpu.memory_space<vmem>>, %arg2: memref<1x128xf32, #tpu.memory_space<vmem>>, %arg3: memref<32x128xbf16, #tpu.memory_space<vmem>>, %arg4: memref<1x128xbf16, #tpu.memory_space<vmem>>, %arg5: memref<128x128xbf16, #tpu.memory_space<vmem>>, %arg6: memref<1x128xbf16, #tpu.memory_space<vmem>>, %arg7: memref<128x128xbf16, #tpu.memory_space<vmem>>, %arg8: memref<256x128xf32, #tpu.memory_space<vmem>>) attributes {dimension_semantics = [#tpu.dimension_semantics<parallel>], iteration_bounds = array<i64: 1>, scalar_prefetch = 0 : i64, scratch_operands = 0 : i64, tpu.core_type = #tpu.core_type<tc>, window_params = [{transform_indices = @transform_0, window_bounds = array<i64: 256, 32>}, {pipeline_mode = #tpu.pipeline_mode<synchronous>, transform_indices = @transform_1, window_bounds = array<i64: 1, 128>}, {pipeline_mode = #tpu.pipeline_mode<synchronous>, transform_indices = @transform_2, window_bounds = array<i64: 32, 128>}, {pipeline_mode = #tpu.pipeline_mode<synchronous>, transform_indices = @transform_3, window_bounds = array<i64: 1, 128>}, {pipeline_mode = #tpu.pipeline_mode<synchronous>, transform_indices = @transform_4, window_bounds = array<i64: 128, 128>}, {pipeline_mode = #tpu.pipeline_mode<synchronous>, transform_indices = @transform_5, window_bounds = array<i64: 1, 128>}, {pipeline_mode = #tpu.pipeline_mode<synchronous>, transform_indices = @transform_6, window_bounds = array<i64: 128, 128>}, {transform_indices = @transform_7, window_bounds = array<i64: 256, 128>}]} {
    %c0 = arith.constant 0 : index
    %c0_0 = arith.constant 0 : index
    %0 = vector.load %arg1[%c0, %c0_0] : memref<256x32xf32, #tpu.memory_space<vmem>>, vector<256x32xf32>
    %1 = arith.truncf %0 : vector<256x32xf32> to vector<256x32xbf16>
    %c0_1 = arith.constant 0 : index
    %c0_2 = arith.constant 0 : index
    %2 = vector.load %arg3[%c0_1, %c0_2] : memref<32x128xbf16, #tpu.memory_space<vmem>>, vector<32x128xbf16>
    %c0_3 = arith.constant 0 : index
    %c0_4 = arith.constant 0 : index
    %3 = vector.load %arg4[%c0_3, %c0_4] : memref<1x128xbf16, #tpu.memory_space<vmem>>, vector<1x128xbf16>
    %4 = arith.extf %3 : vector<1x128xbf16> to vector<1x128xf32>
    %cst = arith.constant dense<0.000000e+00> : vector<256x128xf32>
    %5 = tpu.matmul %1, %2, %cst {dimension_numbers = #tpu.dot_dimension_numbers<[1], [0], [0], [1], [0, 0, 1, 1], [], []>} : vector<256x32xbf16>, vector<32x128xbf16>, vector<256x128xf32> -> vector<256x128xf32>
    %6 = vector.broadcast %4 : vector<1x128xf32> to vector<256x128xf32>
    %7 = arith.addf %5, %6 : vector<256x128xf32>
    %cst_5 = arith.constant 0.000000e+00 : f32
    %8 = vector.broadcast %cst_5 : f32 to vector<256x128xf32>
    %9 = arith.maximumf %7, %8 : vector<256x128xf32>
    %10 = arith.truncf %9 : vector<256x128xf32> to vector<256x128xbf16>
    %c0_6 = arith.constant 0 : index
    %c0_7 = arith.constant 0 : index
    %11 = vector.load %arg5[%c0_6, %c0_7] : memref<128x128xbf16, #tpu.memory_space<vmem>>, vector<128x128xbf16>
    %c0_8 = arith.constant 0 : index
    %c0_9 = arith.constant 0 : index
    %12 = vector.load %arg6[%c0_8, %c0_9] : memref<1x128xbf16, #tpu.memory_space<vmem>>, vector<1x128xbf16>
    %13 = arith.extf %12 : vector<1x128xbf16> to vector<1x128xf32>
    %cst_10 = arith.constant dense<0.000000e+00> : vector<256x128xf32>
    %14 = tpu.matmul %10, %11, %cst_10 {dimension_numbers = #tpu.dot_dimension_numbers<[1], [0], [0], [1], [0, 0, 1, 1], [], []>} : vector<256x128xbf16>, vector<128x128xbf16>, vector<256x128xf32> -> vector<256x128xf32>
    %15 = vector.broadcast %13 : vector<1x128xf32> to vector<256x128xf32>
    %16 = arith.addf %14, %15 : vector<256x128xf32>
    %cst_11 = arith.constant 0.000000e+00 : f32
    %17 = vector.broadcast %cst_11 : f32 to vector<256x128xf32>
    %18 = arith.maximumf %16, %17 : vector<256x128xf32>
    %19 = arith.truncf %18 : vector<256x128xf32> to vector<256x128xbf16>
    %c0_12 = arith.constant 0 : index
    %c0_13 = arith.constant 0 : index
    %20 = vector.load %arg7[%c0_12, %c0_13] : memref<128x128xbf16, #tpu.memory_space<vmem>>, vector<128x128xbf16>
    %cst_14 = arith.constant dense<0.000000e+00> : vector<256x128xf32>
    %21 = tpu.matmul %19, %20, %cst_14 {dimension_numbers = #tpu.dot_dimension_numbers<[1], [0], [0], [1], [0, 0, 1, 1], [], []>} : vector<256x128xbf16>, vector<128x128xbf16>, vector<256x128xf32> -> vector<256x128xf32>
    %c0_15 = arith.constant 0 : index
    %c0_16 = arith.constant 0 : index
    %22 = vector.load %arg2[%c0_15, %c0_16] : memref<1x128xf32, #tpu.memory_space<vmem>>, vector<1x128xf32>
    %23 = vector.broadcast %22 : vector<1x128xf32> to vector<256x128xf32>
    %24 = arith.addf %21, %23 : vector<256x128xf32>
    %cst_17 = arith.constant dense<0xFF800000> : vector<256xf32>
    %25 = vector.multi_reduction <maximumf>, %24, %cst_17 [1] : vector<256x128xf32> to vector<256xf32>
    %26 = vector.shape_cast %25 : vector<256xf32> to vector<256x1xf32>
    %27 = vector.broadcast %26 : vector<256x1xf32> to vector<256x128xf32>
    %28 = arith.subf %24, %27 : vector<256x128xf32>
    %29 = math.exp %28 : vector<256x128xf32>
    %cst_18 = arith.constant dense<0.000000e+00> : vector<256xf32>
    %30 = vector.multi_reduction <add>, %29, %cst_18 [1] : vector<256x128xf32> to vector<256xf32>
    %31 = vector.shape_cast %30 : vector<256xf32> to vector<256x1xf32>
    %32 = vector.broadcast %31 : vector<256x1xf32> to vector<256x128xf32>
    %33 = arith.divf %29, %32 : vector<256x128xf32>
    %c0_19 = arith.constant 0 : index
    %c0_20 = arith.constant 0 : index
    %34 = vector.load %arg8[%c0_19, %c0_20] : memref<256x128xf32, #tpu.memory_space<vmem>>, vector<256x128xf32>
    tpu.vector_store %arg8[%c0_19, %c0_20], %33 {strides = array<i32>} : memref<256x128xf32, #tpu.memory_space<vmem>>, vector<256x128xf32>,
    return
  }
  func.func @transform_0(%arg0: i32) -> (i32, i32) {
    %c0_i32 = arith.constant 0 : i32
    %c0_i32_0 = arith.constant 0 : i32
    return %arg0, %c0_i32 : i32, i32
  }
  func.func @transform_1(%arg0: i32) -> (i32, i32) {
    %c0_i32 = arith.constant 0 : i32
    %c0_i32_0 = arith.constant 0 : i32
    %c0_i32_1 = arith.constant 0 : i32
    return %c0_i32, %c0_i32_0 : i32, i32
  }
  func.func @transform_2(%arg0: i32) -> (i32, i32) {
    %c0_i32 = arith.constant 0 : i32
    %c0_i32_0 = arith.constant 0 : i32
    %c0_i32_1 = arith.constant 0 : i32
    return %c0_i32, %c0_i32_0 : i32, i32
  }
  func.func @transform_3(%arg0: i32) -> (i32, i32) {
    %c0_i32 = arith.constant 0 : i32
    %c0_i32_0 = arith.constant 0 : i32
    %c0_i32_1 = arith.constant 0 : i32
    return %c0_i32, %c0_i32_0 : i32, i32
  }
  func.func @transform_4(%arg0: i32) -> (i32, i32) {
    %c0_i32 = arith.constant 0 : i32
    %c0_i32_0 = arith.constant 0 : i32
    %c0_i32_1 = arith.constant 0 : i32
    return %c0_i32, %c0_i32_0 : i32, i32
  }
  func.func @transform_5(%arg0: i32) -> (i32, i32) {
    %c0_i32 = arith.constant 0 : i32
    %c0_i32_0 = arith.constant 0 : i32
    %c0_i32_1 = arith.constant 0 : i32
    return %c0_i32, %c0_i32_0 : i32, i32
  }
  func.func @transform_6(%arg0: i32) -> (i32, i32) {
    %c0_i32 = arith.constant 0 : i32
    %c0_i32_0 = arith.constant 0 : i32
    %c0_i32_1 = arith.constant 0 : i32
    return %c0_i32, %c0_i32_0 : i32, i32
  }
  func.func @transform_7(%arg0: i32) -> (i32, i32) {
    %c0_i32 = arith.constant 0 : i32
    %c0_i32_0 = arith.constant 0 : i32
    return %arg0, %c0_i32 : i32, i32
  }
}

</mosaic_0001>

<bundles_post_ra>
// kernel: action_value_forward.1
= control target key start
LH: loop header
LB: loop body
LE: loop exit
PB: predicated region body
PF: predicated region fallthrough
CT: control target
= control target key end

     0   :  { %vm94_vm0 = vcmask 261120   ;;  %s2345_s2 = inlined_call_operand.vmem [shape: bf16[32,128], index: 2, kind: input, shape index: {}]   ;;  %s2346_s0 = inlined_call_operand.vmem [shape: f32[256,32], index: 0, kind: input, shape index: {}]   ;;  %s2347_s4 = inlined_call_operand.vmem [shape: bf16[128,128], index: 4, kind: input, shape index: {}]   ;;  %s2348_s3 = inlined_call_operand.vmem [shape: bf16[1,128], index: 3, kind: input, shape index: {}]   ;;  %s2349_s6 = inlined_call_operand.vmem [shape: bf16[128,128], index: 6, kind: input, shape index: {}]   ;;  %s2350_s5 = inlined_call_operand.vmem [shape: bf16[1,128], index: 5, kind: input, shape index: {}]   ;;  %s2351_s1 = inlined_call_operand.vmem [shape: f32[1,128], index: 1, kind: input, shape index: {}]   ;;  %s2352_s7 = inlined_call_operand.vmem [shape: f32[256,128], index: 7, kind: output, shape index: {}]  }
   0x1   :  { %v1470_v0 = vld [vmem:[%s2345_s2 + $0x8] sm:$0xff]  ;;  %v1469_v1 = vld [vmem:[%s2345_s2] sm:$0xff]  ;;  %v29_v5 = vld [vmem:[%s2346_s0 + $0x10] sm:$0xff] }
   0x2   :  { %149 = vmatpush.bf16.msra.mxu0 %v1470_v0  ;;  %v27_v2 = vld [vmem:[%s2346_s0] sm:$0xff]  ;;  %v28_v3 = vld [vmem:[%s2346_s0 + $0x8] sm:$0xff]  ;;  %1487 = vmatpush.bf16.msra.mxu3 %v1470_v0  ;;  %v30_v6 = vld [vmem:[%s2346_s0 + $0x18] sm:$0xff] }
   0x3   :  { %v59_v4 = vpack.c.bf16 %v28_v3, %v27_v2  ;;  %v60_v7 = vpack.c.bf16 %v30_v6, %v29_v5  ;;  %v31_v8 = vld [vmem:[%s2346_s0 + $0x20] sm:$0xff]  ;;  %v32_v9 = vld [vmem:[%s2346_s0 + $0x28] sm:$0xff]  ;;  %v33_v11 = vld [vmem:[%s2346_s0 + $0x30] sm:$0xff] }
   0x4   :  { %v61_v10 = vpack.c.bf16 %v32_v9, %v31_v8  ;;  %v34_v12 = vld [vmem:[%s2346_s0 + $0x38] sm:$0xff]  ;;  %v35_v14 = vld [vmem:[%s2346_s0 + $0x40] sm:$0xff]  ;;  %v36_v15 = vld [vmem:[%s2346_s0 + $0x48] sm:$0xff] }
   0x5   :  { %v62_v13 = vpack.c.bf16 %v34_v12, %v33_v11  ;;  %v63_v16 = vpack.c.bf16 %v36_v15, %v35_v14  ;;  %v1478_v17 = vld [vmem:[%s2347_s4 + $0x38] sm:$0xff]  ;;  %v37_v18 = vld [vmem:[%s2346_s0 + $0x50] sm:$0xff]  ;;  %v1476_v22 = vld [vmem:[%s2347_s4 + $0x28] sm:$0xff] }
   0x6   :  { %150 = vmatpush.bf16.msra.mxu0 %v1469_v1  ;;  %1488 = vmatpush.bf16.msra.mxu3 %v1469_v1  ;;  %v38_v19 = vld [vmem:[%s2346_s0 + $0x58] sm:$0xff]  ;;  %v1477_v21 = vld [vmem:[%s2347_s4 + $0x30] sm:$0xff]  ;;  %v1475_v23 = vld [vmem:[%s2347_s4 + $0x20] sm:$0xff] }
   0x7   :  { %347 = vmatpush.bf16.msra.mxu1 %v1478_v17  ;;  %v64_v20 = vpack.c.bf16 %v38_v19, %v37_v18  ;;  %v39_v24 = vld [vmem:[%s2346_s0 + $0x60] sm:$0xff]  ;;  %v40_v25 = vld [vmem:[%s2346_s0 + $0x68] sm:$0xff]  ;;  %v1474_v26 = vld [vmem:[%s2347_s4 + $0x18] sm:$0xff] }
   0x8   :  { %v65_v27 = vpack.c.bf16 %v40_v25, %v39_v24  ;;  %v1473_v28 = vld [vmem:[%s2347_s4 + $0x10] sm:$0xff]  ;;  %v1472_v29 = vld [vmem:[%s2347_s4 + $0x8] sm:$0xff]  ;;  %v1471_v30 = vld [vmem:[%s2347_s4] sm:$0xff] }
   0x9   :  { %1389 = vmatmul.msk.bf16.vlgmr.msra.gmra.mxu0 %vm94_vm0, %v59_v4  ;;  %v41_v31 = vld [vmem:[%s2346_s0 + $0x70] sm:$0xff]  ;;  %v42_v32 = vld [vmem:[%s2346_s0 + $0x78] sm:$0xff]  ;;  %v79_v34 = vld [vmem:[%s2348_s3] sm:$0x1] }
   0xa   :  { %1489 = vmatpush.bf16.msrb.mxu3 %v1478_v17  ;;  %v66_v33 = vpack.c.bf16 %v42_v32, %v41_v31  ;;  %v43_v35 = vld [vmem:[%s2346_s0 + $0x80] sm:$0xff]  ;;  %v44_v36 = vld [vmem:[%s2346_s0 + $0x88] sm:$0xff]  ;;  %v80_v37 = vunpack.c.l.bf16 %v79_v34  ;;  %v45_v46 = vld [vmem:[%s2346_s0 + $0x90] sm:$0xff] }
   0xb   :  { %348 = vmatpush.bf16.msra.mxu1 %v1477_v21  ;;  %v67_v38 = vpack.c.bf16 %v44_v36, %v43_v35  ;;  %v46_v47 = vld [vmem:[%s2346_s0 + $0x98] sm:$0xff]  ;;  %v47_v56 = vld [vmem:[%s2346_s0 + $0xa0] sm:$0xff]  ;;  %v48_v57 = vld [vmem:[%s2346_s0 + $0xa8] sm:$0xff] }
   0xc   :  { %v1769_v40 = vperm.slane %v80_v37, 0  ;;  %v68_v49 = vpack.c.bf16 %v46_v47, %v45_v46  ;;  %v69_v59 = vpack.c.bf16 %v48_v57, %v47_v56  ;;  %v53_v61 = vld [vmem:[%s2346_s0 + $0xd0] sm:$0xff]  ;;  %v54_v62 = vld [vmem:[%s2346_s0 + $0xd8] sm:$0xff]  ;;  %v56_v11 = vld [vmem:[%s2346_s0 + $0xe8] sm:$0xff] }
   0xd   :  { %v72_v63 = vpack.c.bf16 %v54_v62, %v53_v61  ;;  %v49_v5 = vld [vmem:[%s2346_s0 + $0xb0] sm:$0xff]  ;;  %v50_v6 = vld [vmem:[%s2346_s0 + $0xb8] sm:$0xff]  ;;  %v51_v18 = vld [vmem:[%s2346_s0 + $0xc0] sm:$0xff] }
   0xe   :  { %1490 = vmatpush.bf16.msrb.mxu3 %v1477_v21  ;;  %v70_v8 = vpack.c.bf16 %v50_v6, %v49_v5  ;;  %v52_v19 = vld [vmem:[%s2346_s0 + $0xc8] sm:$0xff]  ;;  %v58_v24 = vld [vmem:[%s2346_s0 + $0xf8] sm:$0xff] }
   0xf   :  { %349 = vmatpush.bf16.msra.mxu1 %v1476_v22  ;;  %1402 = vmatmul.msk.bf16.vlgmr.msra.gmra.mxu3 %vm94_vm0, %v72_v63  ;;  %v71_v21 = vpack.c.bf16 %v52_v19, %v51_v18  ;;  %v1486_v36 = vld [vmem:[%s2349_s6 + $0x38] sm:$0xff] }
  0x10   :  { %552 = vmatpush.bf16.msra.mxu2 %v1486_v36 }
  0x12   :  { %1491 = vmatpush.bf16.msrb.mxu3 %v1476_v22 }
  0x13   :  { %350 = vmatpush.bf16.msra.mxu1 %v1475_v23 }
  0x16   :  { %1492 = vmatpush.bf16.msrb.mxu3 %v1475_v23  ;;  %v57_v23 = vld [vmem:[%s2346_s0 + $0xf0] sm:$0xff] }
  0x17   :  { %351 = vmatpush.bf16.msra.mxu1 %v1474_v26  ;;  %v74_v25 = vpack.c.bf16 %v58_v24, %v57_v23 }
  0x19   :  { %1390 = vmatmul.msk.bf16.gmra.mxu0 %vm94_vm0, %v60_v7 }
  0x1a   :  { %1493 = vmatpush.bf16.msrb.mxu3 %v1474_v26 }
  0x1b   :  { %352 = vmatpush.bf16.msra.mxu1 %v1473_v28 }
  0x1e   :  { %1494 = vmatpush.bf16.msrb.mxu3 %v1473_v28 }
  0x1f   :  { %353 = vmatpush.bf16.msra.mxu1 %v1472_v29 }
  0x22   :  { %1495 = vmatpush.bf16.msrb.mxu3 %v1472_v29 }
  0x23   :  { %354 = vmatpush.bf16.msra.mxu1 %v1471_v30 }
  0x26   :  { %1496 = vmatpush.bf16.msrb.mxu3 %v1471_v30 }
  0x29   :  { %1391 = vmatmul.msk.bf16.gmra.mxu0 %vm94_vm0, %v61_v10  ;;  %v55_v10 = vld [vmem:[%s2346_s0 + $0xe0] sm:$0xff] }
  0x2a   :  { %v73_v12 = vpack.c.bf16 %v56_v11, %v55_v10  ;;  %1497 = vmatpush.bf16.msra.mxu3 %v1486_v36 }
  0x2c   :  { %1403 = vmatmul.msk.bf16.gmra.mxu3 %vm94_vm0, %v73_v12 }
  0x39   :  { %1392 = vmatmul.msk.bf16.gmra.mxu0 %vm94_vm0, %v62_v13 }
  0x3c   :  { %1404 = vmatmul.msk.bf16.gmra.mxu3 %vm94_vm0, %v74_v25 }
  0x49   :  { %1393 = vmatmul.msk.bf16.gmra.mxu0 %vm94_vm0, %v63_v16 }
  0x59   :  { %1394 = vmatmul.msk.bf16.gmra.mxu0 %vm94_vm0, %v64_v20 }
  0x69   :  { %1395 = vmatmul.msk.bf16.gmra.mxu0 %vm94_vm0, %v65_v27 }
  0x79   :  { %1396 = vmatmul.msk.bf16.gmra.mxu0 %vm94_vm0, %v66_v33 }
  0x86   :  { %v152_v39 = vpop.f32.mrf.mxu0 }
  0x87   :  { %v153_v41 = vadd.f32 %v152_v39, %v1769_v40 }
  0x89   :  { %1397 = vmatmul.msk.bf16.gmra.mxu0 %vm94_vm0, %v67_v38  ;;  %v232_v44 = vmax.f32 %v153_v41, 0.0  ;;  %v1485_v41 = vld [vmem:[%s2349_s6 + $0x30] sm:$0xff] }
  0x8a   :  { %553 = vmatpush.bf16.msra.mxu2 %v1485_v41  ;;  %1498 = vmatpush.bf16.msra.mxu3 %v1485_v41 }
  0x8e   :  { %v154_v42 = vpop.f32.mrf.mxu0 }
  0x8f   :  { %v155_v43 = vadd.f32 %v154_v42, %v1769_v40 }
  0x91   :  { %v233_v45 = vmax.f32 %v155_v43, 0.0  ;;  %v1484_v43 = vld [vmem:[%s2349_s6 + $0x28] sm:$0xff] }
  0x92   :  { %554 = vmatpush.bf16.msra.mxu2 %v1484_v43  ;;  %1499 = vmatpush.bf16.msra.mxu3 %v1484_v43 }
  0x93   :  { %v264_v48 = vpack.c.bf16 %v233_v45, %v232_v44  ;;  %v1483_v44 = vld [vmem:[%s2349_s6 + $0x20] sm:$0xff] }
  0x95   :  { %355 = vmatmul.bf16.vlgmr.msra.gmra.mxu1 %v264_v48  ;;  %v1482_v48 = vld [vmem:[%s2349_s6 + $0x18] sm:$0xff] }
  0x96   :  { %v157_v50 = vpop.f32.mrf.mxu0  ;;  %555 = vmatpush.bf16.msra.mxu2 %v1483_v44  ;;  %1500 = vmatpush.bf16.msra.mxu3 %v1483_v44 }
  0x97   :  { %v158_v51 = vadd.f32 %v157_v50, %v1769_v40 }
  0x99   :  { %1398 = vmatmul.msk.bf16.gmra.mxu0 %vm94_vm0, %v68_v49  ;;  %v234_v54 = vmax.f32 %v158_v51, 0.0 }
  0x9a   :  { %556 = vmatpush.bf16.msra.mxu2 %v1482_v48  ;;  %1501 = vmatpush.bf16.msra.mxu3 %v1482_v48 }
  0x9e   :  { %v159_v52 = vpop.f32.mrf.mxu0 }
  0x9f   :  { %v160_v53 = vadd.f32 %v159_v52, %v1769_v40  ;;  %v1481_v52 = vld [vmem:[%s2349_s6 + $0x10] sm:$0xff] }
  0xa0   :  { %557 = vmatpush.bf16.msra.mxu2 %v1481_v52  ;;  %1502 = vmatpush.bf16.msra.mxu3 %v1481_v52 }
  0xa1   :  { %v235_v55 = vmax.f32 %v160_v53, 0.0 }
  0xa3   :  { %v265_v58 = vpack.c.bf16 %v235_v55, %v234_v54  ;;  %v1480_v54 = vld [vmem:[%s2349_s6 + $0x8] sm:$0xff]  ;;  %v1479_v55 = vld [vmem:[%s2349_s6] sm:$0xff] }
  0xa4   :  { %558 = vmatpush.bf16.msra.mxu2 %v1480_v54  ;;  %1503 = vmatpush.bf16.msra.mxu3 %v1480_v54 }
  0xa5   :  { %360 = vmatmul.bf16.gmra.mxu1 %v265_v58 }
  0xa6   :  { %v162_v60 = vpop.f32.mrf.mxu0 }
  0xa7   :  { %v163_v0 = vadd.f32 %v162_v60, %v1769_v40 }
  0xa8   :  { %559 = vmatpush.bf16.msra.mxu2 %v1479_v55  ;;  %1504 = vmatpush.bf16.msra.mxu3 %v1479_v55 }
  0xa9   :  { %1399 = vmatmul.msk.bf16.gmra.mxu0 %vm94_vm0, %v69_v59  ;;  %v236_v3 = vmax.f32 %v163_v0, 0.0 }
  0xae   :  { %v164_v1 = vpop.f32.mrf.mxu0 }
  0xaf   :  { %v165_v2 = vadd.f32 %v164_v1, %v1769_v40  ;;  %v296_v1 = vld [vmem:[%s2350_s5] sm:$0x1] }
  0xb0   :  { %v297_v5 = vunpack.c.l.bf16 %v296_v1 }
  0xb1   :  { %v237_v4 = vmax.f32 %v165_v2, 0.0 }
  0xb3   :  { %v266_v7 = vpack.c.bf16 %v237_v4, %v236_v3 }
  0xb5   :  { %365 = vmatmul.bf16.gmra.mxu1 %v266_v7 }
  0xb6   :  { %v167_v9 = vpop.f32.mrf.mxu0 }
  0xb7   :  { %v168_v13 = vadd.f32 %v167_v9, %v1769_v40 }
  0xb9   :  { %1400 = vmatmul.msk.bf16.gmra.mxu0 %vm94_vm0, %v70_v8  ;;  %v238_v16 = vmax.f32 %v168_v13, 0.0  ;;  %v1866_v8 = vperm.slane %v297_v5, 0 }
  0xbe   :  { %v169_v14 = vpop.f32.mrf.mxu0 }
  0xbf   :  { %v170_v15 = vadd.f32 %v169_v14, %v1769_v40 }
  0xc1   :  { %v239_v17 = vmax.f32 %v170_v15, 0.0 }
  0xc3   :  { %v267_v20 = vpack.c.bf16 %v239_v17, %v238_v16 }
  0xc5   :  { %370 = vmatmul.bf16.gmra.mxu1 %v267_v20 }
  0xc6   :  { %v172_v22 = vpop.f32.mrf.mxu0 }
  0xc7   :  { %v173_v26 = vadd.f32 %v172_v22, %v1769_v40 }
  0xc9   :  { %1401 = vmatmul.msk.bf16.gmra.mxu0 %vm94_vm0, %v71_v21  ;;  %v240_v29 = vmax.f32 %v173_v26, 0.0 }
  0xce   :  { %v174_v27 = vpop.f32.mrf.mxu0 }
  0xcf   :  { %v175_v28 = vadd.f32 %v174_v27, %v1769_v40 }
  0xd1   :  { %v241_v30 = vmax.f32 %v175_v28, 0.0 }
  0xd3   :  { %v268_v31 = vpack.c.bf16 %v241_v30, %v240_v29 }
  0xd5   :  { %375 = vmatmul.bf16.gmra.mxu1 %v268_v31 }
  0xd6   :  { %v177_v32 = vpop.f32.mrf.mxu0 }
  0xd7   :  { %v178_v33 = vadd.f32 %v177_v32, %v1769_v40 }
  0xd9   :  { %v242_v37 = vmax.f32 %v178_v33, 0.0 }
  0xde   :  { %v179_v34 = vpop.f32.mrf.mxu0 }
  0xdf   :  { %v180_v35 = vadd.f32 %v179_v34, %v1769_v40 }
  0xe1   :  { %v243_v38 = vmax.f32 %v180_v35, 0.0 }
  0xe3   :  { %v269_v39 = vpack.c.bf16 %v243_v38, %v242_v37 }
  0xe5   :  { %380 = vmatmul.bf16.gmra.mxu1 %v269_v39 }
  0xe6   :  { %v182_v42 = vpop.f32.mrf.mxu0 }
  0xe7   :  { %v183_v45 = vadd.f32 %v182_v42, %v1769_v40 }
  0xe9   :  { %v244_v49 = vmax.f32 %v183_v45, 0.0 }
  0xee   :  { %v184_v46 = vpop.f32.mrf.mxu0 }
  0xef   :  { %v185_v47 = vadd.f32 %v184_v46, %v1769_v40 }
  0xf1   :  { %v245_v50 = vmax.f32 %v185_v47, 0.0 }
  0xf3   :  { %v270_v51 = vpack.c.bf16 %v245_v50, %v244_v49 }
  0xf5   :  { %385 = vmatmul.bf16.gmra.mxu1 %v270_v51 }
  0xf6   :  { %v187_v53 = vpop.f32.mrf.mxu0 }
  0xf7   :  { %v188_v56 = vadd.f32 %v187_v53, %v1769_v40  ;;  %v217_v53 = vpop.f32.mrf.mxu3 }
  0xf9   :  { %v246_v59 = vmax.f32 %v188_v56, 0.0 }
  0xfe   :  { %v189_v57 = vpop.f32.mrf.mxu0 }
  0xff   :  { %v190_v58 = vadd.f32 %v189_v57, %v1769_v40 }
 0x101   :  { %v247_v60 = vmax.f32 %v190_v58, 0.0 }
 0x103   :  { %v271_v61 = vpack.c.bf16 %v247_v60, %v246_v59 }
 0x105   :  { %390 = vmatmul.bf16.gmra.mxu1 %v271_v61 }
 0x106   :  { %v192_v62 = vpop.f32.mrf.mxu0 }
 0x107   :  { %v193_v63 = vadd.f32 %v192_v62, %v1769_v40 }
 0x109   :  { %v248_v3 = vmax.f32 %v193_v63, 0.0  ;;  %v219_v63 = vpop.f32.mrf.mxu3 }
 0x10e   :  { %v194_v0 = vpop.f32.mrf.mxu0 }
 0x10f   :  { %v195_v2 = vadd.f32 %v194_v0, %v1769_v40 }
 0x111   :  { %v249_v4 = vmax.f32 %v195_v2, 0.0 }
 0x112   :  { %v356_v6 = vpop.f32.mrf.mxu1 }
 0x113   :  { %v272_v7 = vpack.c.bf16 %v249_v4, %v248_v3  ;;  %v357_v10 = vadd.f32 %v356_v6, %v1866_v8  ;;  %v222_v6 = vpop.f32.mrf.mxu3 }
 0x115   :  { %395 = vmatmul.bf16.gmra.mxu1 %v272_v7  ;;  %v436_v13 = vmax.f32 %v357_v10, 0.0  ;;  %v218_v7 = vadd.f32 %v217_v53, %v1769_v40 }
 0x116   :  { %v197_v9 = vpop.f32.mrf.mxu0 }
 0x117   :  { %v198_v14 = vadd.f32 %v197_v9, %v1769_v40  ;;  %v220_v9 = vadd.f32 %v219_v63, %v1769_v40 }
 0x119   :  { %v250_v19 = vmax.f32 %v198_v14, 0.0  ;;  %v259_v14 = vmax.f32 %v220_v9, 0.0 }
 0x11a   :  { %v358_v11 = vpop.f32.mrf.mxu1 }
 0x11b   :  { %v359_v12 = vadd.f32 %v358_v11, %v1866_v8 }
 0x11d   :  { %v437_v15 = vmax.f32 %v359_v12, 0.0 }
 0x11e   :  { %v199_v16 = vpop.f32.mrf.mxu0 }
 0x11f   :  { %v200_v17 = vadd.f32 %v199_v16, %v1769_v40  ;;  %v468_v18 = vpack.c.bf16 %v437_v15, %v436_v13  ;;  %v258_v13 = vmax.f32 %v218_v7, 0.0 }
 0x121   :  { %v251_v20 = vmax.f32 %v200_v17, 0.0  ;;  %560 = vmatmul.bf16.vlgmr.msra.gmra.mxu2 %v468_v18  ;;  %v277_v17 = vpack.c.bf16 %v259_v14, %v258_v13  ;;  %v224_v18 = vpop.f32.mrf.mxu3 }
 0x122   :  { %v361_v21 = vpop.f32.mrf.mxu1 }
 0x123   :  { %v273_v22 = vpack.c.bf16 %v251_v20, %v250_v19  ;;  %v362_v24 = vadd.f32 %v361_v21, %v1866_v8  ;;  %v223_v21 = vadd.f32 %v222_v6, %v1769_v40 }
 0x125   :  { %400 = vmatmul.bf16.gmra.mxu1 %v273_v22  ;;  %v438_v27 = vmax.f32 %v362_v24, 0.0  ;;  %v225_v22 = vadd.f32 %v224_v18, %v1769_v40 }
 0x126   :  { %v202_v23 = vpop.f32.mrf.mxu0 }
 0x127   :  { %v203_v28 = vadd.f32 %v202_v23, %v1769_v40 }
 0x129   :  { %v252_v33 = vmax.f32 %v203_v28, 0.0  ;;  %v261_v28 = vmax.f32 %v225_v22, 0.0 }
 0x12a   :  { %v363_v25 = vpop.f32.mrf.mxu1 }
 0x12b   :  { %v364_v26 = vadd.f32 %v363_v25, %v1866_v8 }
 0x12d   :  { %v439_v29 = vmax.f32 %v364_v26, 0.0  ;;  %v227_v26 = vpop.f32.mrf.mxu3 }
 0x12e   :  { %v204_v30 = vpop.f32.mrf.mxu0 }
 0x12f   :  { %v205_v31 = vadd.f32 %v204_v30, %v1769_v40  ;;  %v469_v32 = vpack.c.bf16 %v439_v29, %v438_v27  ;;  %v260_v27 = vmax.f32 %v223_v21, 0.0 }
 0x131   :  { %v253_v34 = vmax.f32 %v205_v31, 0.0  ;;  %565 = vmatmul.bf16.gmra.mxu2 %v469_v32  ;;  %v278_v31 = vpack.c.bf16 %v261_v28, %v260_v27 }
 0x132   :  { %v366_v35 = vpop.f32.mrf.mxu1 }
 0x133   :  { %v274_v36 = vpack.c.bf16 %v253_v34, %v252_v33  ;;  %v367_v38 = vadd.f32 %v366_v35, %v1866_v8  ;;  %v228_v35 = vadd.f32 %v227_v26, %v1769_v40 }
 0x135   :  { %405 = vmatmul.bf16.gmra.mxu1 %v274_v36  ;;  %v440_v42 = vmax.f32 %v367_v38, 0.0  ;;  %v229_v32 = vpop.f32.mrf.mxu3 }
 0x136   :  { %v207_v37 = vpop.f32.mrf.mxu0  ;;  %v230_v36 = vadd.f32 %v229_v32, %v1769_v40 }
 0x137   :  { %v208_v43 = vadd.f32 %v207_v37, %v1769_v40 }
 0x139   :  { %v254_v48 = vmax.f32 %v208_v43, 0.0 }
 0x13a   :  { %v368_v39 = vpop.f32.mrf.mxu1 }
 0x13b   :  { %v369_v41 = vadd.f32 %v368_v39, %v1866_v8 }
 0x13d   :  { %v441_v44 = vmax.f32 %v369_v41, 0.0  ;;  %v262_v41 = vmax.f32 %v228_v35, 0.0 }
 0x13e   :  { %v209_v45 = vpop.f32.mrf.mxu0 }
 0x13f   :  { %v210_v46 = vadd.f32 %v209_v45, %v1769_v40  ;;  %v470_v47 = vpack.c.bf16 %v441_v44, %v440_v42  ;;  %v263_v42 = vmax.f32 %v230_v36, 0.0 }
 0x141   :  { %v255_v49 = vmax.f32 %v210_v46, 0.0  ;;  %570 = vmatmul.bf16.gmra.mxu2 %v470_v47  ;;  %v279_v45 = vpack.c.bf16 %v263_v42, %v262_v41 }
 0x142   :  { %v371_v50 = vpop.f32.mrf.mxu1 }
 0x143   :  { %v275_v51 = vpack.c.bf16 %v255_v49, %v254_v48  ;;  %v372_v54 = vadd.f32 %v371_v50, %v1866_v8 }
 0x145   :  { %410 = vmatmul.bf16.gmra.mxu1 %v275_v51  ;;  %v442_v57 = vmax.f32 %v372_v54, 0.0 }
 0x146   :  { %v212_v52 = vpop.f32.mrf.mxu0 }
 0x147   :  { %v213_v58 = vadd.f32 %v212_v52, %v1769_v40 }
 0x149   :  { %v256_v0 = vmax.f32 %v213_v58, 0.0  ;;  %v1903_v58 = vld [vmem:[%s2351_s1] ss:$0 sm:$0xff] }
 0x14a   :  { %v373_v55 = vpop.f32.mrf.mxu1 }
 0x14b   :  { %v374_v56 = vadd.f32 %v373_v55, %v1866_v8 }
 0x14d   :  { %v443_v59 = vmax.f32 %v374_v56, 0.0 }
 0x14e   :  { %v214_v60 = vpop.f32.mrf.mxu0 }
 0x14f   :  { %v215_v61 = vadd.f32 %v214_v60, %v1769_v40  ;;  %v471_v62 = vpack.c.bf16 %v443_v59, %v442_v57 }
 0x151   :  { %v257_v1 = vmax.f32 %v215_v61, 0.0  ;;  %575 = vmatmul.bf16.gmra.mxu2 %v471_v62 }
 0x152   :  { %v376_v2 = vpop.f32.mrf.mxu1 }
 0x153   :  { %v276_v3 = vpack.c.bf16 %v257_v1, %v256_v0  ;;  %v377_v4 = vadd.f32 %v376_v2, %v1866_v8 }
 0x155   :  { %415 = vmatmul.bf16.vlgmr.msrb.gmra.mxu3 %v276_v3  ;;  %v444_v11 = vmax.f32 %v377_v4, 0.0 }
 0x15a   :  { %v378_v5 = vpop.f32.mrf.mxu1 }
 0x15b   :  { %v379_v10 = vadd.f32 %v378_v5, %v1866_v8 }
 0x15d   :  { %v445_v12 = vmax.f32 %v379_v10, 0.0 }
 0x15f   :  { %v472_v15 = vpack.c.bf16 %v445_v12, %v444_v11 }
 0x161   :  { %580 = vmatmul.bf16.gmra.mxu2 %v472_v15 }
 0x162   :  { %v381_v16 = vpop.f32.mrf.mxu1 }
 0x163   :  { %v382_v19 = vadd.f32 %v381_v16, %v1866_v8 }
 0x165   :  { %420 = vmatmul.bf16.gmra.mxu3 %v277_v17  ;;  %v446_v24 = vmax.f32 %v382_v19, 0.0 }
 0x16a   :  { %v383_v20 = vpop.f32.mrf.mxu1 }
 0x16b   :  { %v384_v23 = vadd.f32 %v383_v20, %v1866_v8 }
 0x16d   :  { %v447_v25 = vmax.f32 %v384_v23, 0.0 }
 0x16f   :  { %v473_v29 = vpack.c.bf16 %v447_v25, %v446_v24 }
 0x171   :  { %585 = vmatmul.bf16.gmra.mxu2 %v473_v29 }
 0x172   :  { %v386_v30 = vpop.f32.mrf.mxu1 }
 0x173   :  { %v387_v33 = vadd.f32 %v386_v30, %v1866_v8 }
 0x175   :  { %425 = vmatmul.bf16.gmra.mxu3 %v278_v31  ;;  %v448_v38 = vmax.f32 %v387_v33, 0.0 }
 0x17a   :  { %v388_v34 = vpop.f32.mrf.mxu1 }
 0x17b   :  { %v389_v37 = vadd.f32 %v388_v34, %v1866_v8 }
 0x17d   :  { %v449_v39 = vmax.f32 %v389_v37, 0.0 }
 0x17f   :  { %v474_v43 = vpack.c.bf16 %v449_v39, %v448_v38 }
 0x181   :  { %590 = vmatmul.bf16.gmra.mxu2 %v474_v43 }
 0x182   :  { %v391_v44 = vpop.f32.mrf.mxu1 }
 0x183   :  { %v392_v46 = vadd.f32 %v391_v44, %v1866_v8 }
 0x185   :  { %430 = vmatmul.bf16.gmra.mxu3 %v279_v45  ;;  %v450_v49 = vmax.f32 %v392_v46, 0.0 }
 0x18a   :  { %v393_v47 = vpop.f32.mrf.mxu1 }
 0x18b   :  { %v394_v48 = vadd.f32 %v393_v47, %v1866_v8 }
 0x18d   :  { %v451_v50 = vmax.f32 %v394_v48, 0.0 }
 0x18f   :  { %v475_v51 = vpack.c.bf16 %v451_v50, %v450_v49 }
 0x191   :  { %595 = vmatmul.bf16.gmra.mxu2 %v475_v51 }
 0x192   :  { %v396_v40 = vpop.f32.mrf.mxu1 }
 0x193   :  { %v397_v52 = vadd.f32 %v396_v40, %v1866_v8 }
 0x195   :  { %v452_v55 = vmax.f32 %v397_v52, 0.0 }
 0x19a   :  { %v398_v53 = vpop.f32.mrf.mxu1 }
 0x19b   :  { %v399_v54 = vadd.f32 %v398_v53, %v1866_v8 }
 0x19d   :  { %v453_v56 = vmax.f32 %v399_v54, 0.0 }
 0x19f   :  { %v476_v57 = vpack.c.bf16 %v453_v56, %v452_v55 }
 0x1a1   :  { %600 = vmatmul.bf16.gmra.mxu2 %v476_v57 }
 0x1a2   :  { %v401_v59 = vpop.f32.mrf.mxu1 }
 0x1a3   :  { %v402_v62 = vadd.f32 %v401_v59, %v1866_v8 }
 0x1a4   :  { %v561_v60 = vpop.f32.mrf.mxu2 }
 0x1a5   :  { %v1906_v61 = vadd.f32 %v1903_v58, %v561_v60  ;;  %v454_v2 = vmax.f32 %v402_v62, 0.0 }
 0x1a7   :  { %641 = vmax.xlane.f32.xlu0 %v1906_v61 }
 0x1aa   :  { %v403_v63 = vpop.f32.mrf.mxu1 }
 0x1ab   :  { %v404_v0 = vadd.f32 %v403_v63, %v1866_v8 }
 0x1ac   :  { %v563_v1 = vpop.f32.mrf.mxu2 }
 0x1ad   :  { %v455_v3 = vmax.f32 %v404_v0, 0.0  ;;  %v1912_v4 = vadd.f32 %v1903_v58, %v563_v1 }
 0x1af   :  { %643 = vmax.xlane.f32.xlu0 %v1912_v4  ;;  %v477_v5 = vpack.c.bf16 %v455_v3, %v454_v2 }
 0x1b1   :  { %605 = vmatmul.bf16.gmra.mxu2 %v477_v5 }
 0x1b2   :  { %v406_v6 = vpop.f32.mrf.mxu1 }
 0x1b3   :  { %v407_v10 = vadd.f32 %v406_v6, %v1866_v8 }
 0x1b4   :  { %v566_v7 = vpop.f32.mrf.mxu2 }
 0x1b5   :  { %v1916_v9 = vadd.f32 %v1903_v58, %v566_v7  ;;  %v456_v14 = vmax.f32 %v407_v10, 0.0 }
 0x1b7   :  { %645 = vmax.xlane.f32.xlu1 %v1916_v9 }
 0x1ba   :  { %v408_v11 = vpop.f32.mrf.mxu1 }
 0x1bb   :  { %v409_v12 = vadd.f32 %v408_v11, %v1866_v8 }
 0x1bc   :  { %v568_v13 = vpop.f32.mrf.mxu2 }
 0x1bd   :  { %v457_v15 = vmax.f32 %v409_v12, 0.0  ;;  %v1922_v16 = vadd.f32 %v1903_v58, %v568_v13 }
 0x1bf   :  { %647 = vmax.xlane.f32.xlu1 %v1922_v16  ;;  %v478_v17 = vpack.c.bf16 %v457_v15, %v456_v14 }
 0x1c1   :  { %610 = vmatmul.bf16.gmra.mxu2 %v478_v17 }
 0x1c2   :  { %v411_v18 = vpop.f32.mrf.mxu1 }
 0x1c3   :  { %v412_v21 = vadd.f32 %v411_v18, %v1866_v8 }
 0x1c4   :  { %v571_v19 = vpop.f32.mrf.mxu2 }
 0x1c5   :  { %v1926_v20 = vadd.f32 %v1903_v58, %v571_v19  ;;  %v458_v25 = vmax.f32 %v412_v21, 0.0 }
 0x1c7   :  { %649 = vmax.xlane.f32.xlu2 %v1926_v20 }
 0x1ca   :  { %v413_v22 = vpop.f32.mrf.mxu1 }
 0x1cb   :  { %v414_v23 = vadd.f32 %v413_v22, %v1866_v8 }
 0x1cc   :  { %v573_v24 = vpop.f32.mrf.mxu2 }
 0x1cd   :  { %v459_v26 = vmax.f32 %v414_v23, 0.0  ;;  %v1932_v27 = vadd.f32 %v1903_v58, %v573_v24 }
 0x1cf   :  { %651 = vmax.xlane.f32.xlu2 %v1932_v27  ;;  %v479_v28 = vpack.c.bf16 %v459_v26, %v458_v25 }
 0x1d1   :  { %615 = vmatmul.bf16.gmra.mxu2 %v479_v28 }
 0x1d4   :  { %v576_v29 = vpop.f32.mrf.mxu2 }
 0x1d5   :  { %v1936_v30 = vadd.f32 %v1903_v58, %v576_v29 }
 0x1d7   :  { %653 = vmax.xlane.f32.xlu0 %v1936_v30 }
 0x1d8   :  { %v416_v31 = vpop.f32.mrf.mxu3 }
 0x1d9   :  { %v417_v34 = vadd.f32 %v416_v31, %v1866_v8 }
 0x1db   :  { %v460_v37 = vmax.f32 %v417_v34, 0.0 }
 0x1dc   :  { %v578_v32 = vpop.f32.mrf.mxu2 }
 0x1dd   :  { %v1940_v33 = vadd.f32 %v1903_v58, %v578_v32 }
 0x1df   :  { %655 = vmax.xlane.f32.xlu1 %v1940_v33 }
 0x1e0   :  { %v418_v35 = vpop.f32.mrf.mxu3 }
 0x1e1   :  { %v419_v36 = vadd.f32 %v418_v35, %v1866_v8 }
 0x1e3   :  { %v461_v38 = vmax.f32 %v419_v36, 0.0 }
 0x1e4   :  { %v581_v39 = vpop.f32.mrf.mxu2 }
 0x1e5   :  { %v480_v41 = vpack.c.bf16 %v461_v38, %v460_v37  ;;  %v1946_v42 = vadd.f32 %v1903_v58, %v581_v39 }
 0x1e7   :  { %620 = vmatmul.bf16.vlgmr.msra.gmra.mxu3 %v480_v41  ;;  %657 = vmax.xlane.f32.xlu2 %v1946_v42 }
 0x1e8   :  { %v421_v43 = vpop.f32.mrf.mxu3 }
 0x1e9   :  { %v422_v46 = vadd.f32 %v421_v43, %v1866_v8 }
 0x1eb   :  { %v462_v49 = vmax.f32 %v422_v46, 0.0 }
 0x1ec   :  { %v583_v44 = vpop.f32.mrf.mxu2 }
 0x1ed   :  { %v1950_v45 = vadd.f32 %v1903_v58, %v583_v44 }
 0x1ef   :  { %659 = vmax.xlane.f32.xlu0 %v1950_v45 }
 0x1f0   :  { %v423_v47 = vpop.f32.mrf.mxu3 }
 0x1f1   :  { %v424_v48 = vadd.f32 %v423_v47, %v1866_v8 }
 0x1f3   :  { %v463_v50 = vmax.f32 %v424_v48, 0.0 }
 0x1f4   :  { %v586_v51 = vpop.f32.mrf.mxu2 }
 0x1f5   :  { %v1956_v40 = vadd.f32 %v1903_v58, %v586_v51  ;;  %v481_v52 = vpack.c.bf16 %v463_v50, %v462_v49 }
 0x1f7   :  { %625 = vmatmul.bf16.gmra.mxu3 %v481_v52  ;;  %661 = vmax.xlane.f32.xlu1 %v1956_v40 }
 0x1f8   :  { %v426_v53 = vpop.f32.mrf.mxu3 }
 0x1f9   :  { %v427_v56 = vadd.f32 %v426_v53, %v1866_v8 }
 0x1fb   :  { %v464_v60 = vmax.f32 %v427_v56, 0.0 }
 0x1fc   :  { %v588_v54 = vpop.f32.mrf.mxu2 }
 0x1fd   :  { %v1960_v55 = vadd.f32 %v1903_v58, %v588_v54 }
 0x1ff   :  { %663 = vmax.xlane.f32.xlu2 %v1960_v55 }
 0x200   :  { %v428_v57 = vpop.f32.mrf.mxu3 }
 0x201   :  { %v429_v59 = vadd.f32 %v428_v57, %v1866_v8 }
 0x203   :  { %v465_v62 = vmax.f32 %v429_v59, 0.0 }
 0x204   :  { %v591_v63 = vpop.f32.mrf.mxu2 }
 0x205   :  { %v1966_v0 = vadd.f32 %v1903_v58, %v591_v63  ;;  %v482_v1 = vpack.c.bf16 %v465_v62, %v464_v60 }
 0x207   :  { %630 = vmatmul.bf16.gmra.mxu3 %v482_v1  ;;  %665 = vmax.xlane.f32.xlu0 %v1966_v0 }
 0x208   :  { %v431_v2 = vpop.f32.mrf.mxu3 }
 0x209   :  { %v432_v6 = vadd.f32 %v431_v2, %v1866_v8 }
 0x20b   :  { %v466_v11 = vmax.f32 %v432_v6, 0.0 }
 0x20c   :  { %v593_v3 = vpop.f32.mrf.mxu2 }
 0x20d   :  { %v1970_v5 = vadd.f32 %v1903_v58, %v593_v3 }
 0x20f   :  { %667 = vmax.xlane.f32.xlu1 %v1970_v5 }
 0x210   :  { %v433_v7 = vpop.f32.mrf.mxu3 }
 0x211   :  { %v434_v10 = vadd.f32 %v433_v7, %v1866_v8 }
 0x213   :  { %v467_v12 = vmax.f32 %v434_v10, 0.0 }
 0x214   :  { %v596_v13 = vpop.f32.mrf.mxu2 }
 0x215   :  { %v1976_v14 = vadd.f32 %v1903_v58, %v596_v13  ;;  %v483_v15 = vpack.c.bf16 %v467_v12, %v466_v11 }
 0x217   :  { %635 = vmatmul.bf16.gmra.mxu3 %v483_v15  ;;  %669 = vmax.xlane.f32.xlu2 %v1976_v14 }
 0x21a   :  { %v642_v17 = vpop.xlane.xlu0 %641 }
 0x21b   :  { %v705_v18 = vsub.f32 %v1906_v61, %v642_v17 }
 0x21c   :  { %v598_v19 = vpop.f32.mrf.mxu2 }
 0x21d   :  { %v737_v21 = vmul.f32 1.442695, %v705_v18  ;;  %v1981_v22 = vadd.f32 %v1903_v58, %v598_v19 }
 0x21f   :  { %1506 = vpow2.f32 %v737_v21  ;;  %671 = vmax.xlane.f32.xlu0 %v1981_v22 }
 0x222   :  { %v644_v8 = vpop.xlane.xlu0 %643 }
 0x223   :  { %v706_v23 = vsub.f32 %v1912_v4, %v644_v8 }
 0x224   :  { %v601_v24 = vpop.f32.mrf.mxu2 }
 0x225   :  { %v1985_v25 = vpop.eup %1506  ;;  %v739_v26 = vmul.f32 1.442695, %v706_v23  ;;  %v1988_v28 = vadd.f32 %v1903_v58, %v601_v24 }
 0x226   :  { %801 = vadd.xlane.f32.xlu2 %v1985_v25 }
 0x227   :  { %1508 = vpow2.f32 %v739_v26  ;;  %673 = vmax.xlane.f32.xlu1 %v1988_v28 }
 0x22a   :  { %v646_v61 = vpop.xlane.xlu1 %645 }
 0x22b   :  { %v707_v29 = vsub.f32 %v1916_v9, %v646_v61 }
 0x22c   :  { %v603_v31 = vpop.f32.mrf.mxu2 }
 0x22d   :  { %v1993_v32 = vpop.eup %1508  ;;  %v741_v34 = vmul.f32 1.442695, %v707_v29  ;;  %v1996_v4 = vadd.f32 %v1903_v58, %v603_v31 }
 0x22e   :  { %803 = vadd.xlane.f32.xlu0 %v1993_v32 }
 0x22f   :  { %1510 = vpow2.f32 %v741_v34  ;;  %675 = vmax.xlane.f32.xlu2 %v1996_v4 }
 0x232   :  { %v648_v35 = vpop.xlane.xlu1 %647 }
 0x233   :  { %v708_v36 = vsub.f32 %v1922_v16, %v648_v35 }
 0x234   :  { %v606_v37 = vpop.f32.mrf.mxu2 }
 0x235   :  { %v2001_v38 = vpop.eup %1510  ;;  %v743_v39 = vmul.f32 1.442695, %v708_v36  ;;  %v2004_v9 = vadd.f32 %v1903_v58, %v606_v37 }
 0x236   :  { %805 = vadd.xlane.f32.xlu1 %v2001_v38 }
 0x237   :  { %1512 = vpow2.f32 %v743_v39  ;;  %677 = vmax.xlane.f32.xlu0 %v2004_v9 }
 0x23a   :  { %v650_v41 = vpop.xlane.xlu2 %649 }
 0x23b   :  { %v709_v43 = vsub.f32 %v1926_v20, %v650_v41 }
 0x23c   :  { %v608_v44 = vpop.f32.mrf.mxu2 }
 0x23d   :  { %v2009_v46 = vpop.eup %1512  ;;  %v745_v47 = vmul.f32 1.442695, %v709_v43  ;;  %v2012_v16 = vadd.f32 %v1903_v58, %v608_v44 }
 0x23e   :  { %807 = vadd.xlane.f32.xlu2 %v2009_v46 }
 0x23f   :  { %1514 = vpow2.f32 %v745_v47  ;;  %679 = vmax.xlane.f32.xlu1 %v2012_v16 }
 0x242   :  { %v652_v48 = vpop.xlane.xlu2 %651 }
 0x243   :  { %v710_v49 = vsub.f32 %v1932_v27, %v652_v48 }
 0x244   :  { %v611_v50 = vpop.f32.mrf.mxu2 }
 0x245   :  { %v2017_v51 = vpop.eup %1514  ;;  %v747_v52 = vmul.f32 1.442695, %v710_v49  ;;  %v2020_v20 = vadd.f32 %v1903_v58, %v611_v50 }
 0x246   :  { %809 = vadd.xlane.f32.xlu0 %v2017_v51 }
 0x247   :  { %1516 = vpow2.f32 %v747_v52  ;;  %681 = vmax.xlane.f32.xlu2 %v2020_v20 }
 0x24a   :  { %v654_v53 = vpop.xlane.xlu0 %653 }
 0x24b   :  { %v711_v54 = vsub.f32 %v1936_v30, %v654_v53 }
 0x24c   :  { %v613_v56 = vpop.f32.mrf.mxu2 }
 0x24d   :  { %v2025_v57 = vpop.eup %1516  ;;  %v749_v59 = vmul.f32 1.442695, %v711_v54  ;;  %v2028_v27 = vadd.f32 %v1903_v58, %v613_v56 }
 0x24e   :  { %811 = vadd.xlane.f32.xlu1 %v2025_v57 }
 0x24f   :  { %1518 = vpow2.f32 %v749_v59  ;;  %683 = vmax.xlane.f32.xlu0 %v2028_v27 }
 0x252   :  { %v656_v60 = vpop.xlane.xlu1 %655 }
 0x253   :  { %v712_v62 = vsub.f32 %v1940_v33, %v656_v60 }
 0x254   :  { %v616_v63 = vpop.f32.mrf.mxu2 }
 0x255   :  { %v2033_v1 = vpop.eup %1518  ;;  %v751_v2 = vmul.f32 1.442695, %v712_v62  ;;  %v2036_v30 = vadd.f32 %v1903_v58, %v616_v63 }
 0x256   :  { %813 = vadd.xlane.f32.xlu2 %v2033_v1 }
 0x257   :  { %1520 = vpow2.f32 %v751_v2  ;;  %685 = vmax.xlane.f32.xlu1 %v2036_v30 }
 0x25a   :  { %v658_v3 = vpop.xlane.xlu2 %657 }
 0x25b   :  { %v713_v6 = vsub.f32 %v1946_v42, %v658_v3 }
 0x25c   :  { %v618_v7 = vpop.f32.mrf.mxu2 }
 0x25d   :  { %v2041_v10 = vpop.eup %1520  ;;  %v753_v11 = vmul.f32 1.442695, %v713_v6  ;;  %v2044_v33 = vadd.f32 %v1903_v58, %v618_v7 }
 0x25e   :  { %815 = vadd.xlane.f32.xlu0 %v2041_v10 }
 0x25f   :  { %1522 = vpow2.f32 %v753_v11  ;;  %687 = vmax.xlane.f32.xlu2 %v2044_v33 }
 0x262   :  { %v660_v12 = vpop.xlane.xlu0 %659 }
 0x263   :  { %v714_v13 = vsub.f32 %v1950_v45, %v660_v12 }
 0x265   :  { %v2049_v15 = vpop.eup %1522  ;;  %v755_v17 = vmul.f32 1.442695, %v714_v13 }
 0x266   :  { %817 = vadd.xlane.f32.xlu1 %v2049_v15 }
 0x267   :  { %1524 = vpow2.f32 %v755_v17 }
 0x26a   :  { %v621_v42 = vpop.f32.mrf.mxu3  ;;  %v662_v18 = vpop.xlane.xlu1 %661 }
 0x26b   :  { %v2053_v19 = vadd.f32 %v1903_v58, %v621_v42  ;;  %v715_v21 = vsub.f32 %v1956_v40, %v662_v18 }
 0x26d   :  { %v2056_v8 = vpop.eup %1524  ;;  %v757_v23 = vmul.f32 1.442695, %v715_v21  ;;  %689 = vmax.xlane.f32.xlu0 %v2053_v19 }
 0x26e   :  { %819 = vadd.xlane.f32.xlu2 %v2056_v8 }
 0x26f   :  { %1526 = vpow2.f32 %v757_v23 }
 0x272   :  { %v623_v45 = vpop.f32.mrf.mxu3  ;;  %v664_v34 = vpop.xlane.xlu2 %663 }
 0x273   :  { %v2061_v24 = vadd.f32 %v1903_v58, %v623_v45  ;;  %v716_v63 = vsub.f32 %v1960_v55, %v664_v34 }
 0x275   :  { %v2063_v26 = vpop.eup %1526  ;;  %691 = vmax.xlane.f32.xlu1 %v2061_v24  ;;  %v759_v2 = vmul.f32 1.442695, %v716_v63 }
 0x276   :  { %821 = vadd.xlane.f32.xlu0 %v2063_v26 }
 0x27a   :  { %v626_v61 = vpop.f32.mrf.mxu3  ;;  %v666_v36 = vpop.xlane.xlu0 %665 }
 0x27b   :  { %v2068_v40 = vadd.f32 %v1903_v58, %v626_v61  ;;  %v717_v39 = vsub.f32 %v1966_v0, %v666_v36 }
 0x27d   :  { %693 = vmax.xlane.f32.xlu2 %v2068_v40  ;;  %v761_v43 = vmul.f32 1.442695, %v717_v39 }
 0x27f   :  { %1528 = vpow2.f32 %v761_v43 }
 0x282   :  { %v628_v29 = vpop.f32.mrf.mxu3  ;;  %v668_v47 = vpop.xlane.xlu1 %667 }
 0x283   :  { %v2072_v31 = vadd.f32 %v1903_v58, %v628_v29  ;;  %v718_v50 = vsub.f32 %v1970_v5, %v668_v47 }
 0x285   :  { %695 = vmax.xlane.f32.xlu0 %v2072_v31  ;;  %v763_v54 = vmul.f32 1.442695, %v718_v50  ;;  %v2089_v62 = vpop.eup %1528 }
 0x28a   :  { %v631_v35 = vpop.f32.mrf.mxu3  ;;  %v670_v41 = vpop.xlane.xlu2 %669 }
 0x28b   :  { %v2076_v37 = vadd.f32 %v1903_v58, %v631_v35  ;;  %v719_v21 = vsub.f32 %v1976_v14, %v670_v41 }
 0x28d   :  { %697 = vmax.xlane.f32.xlu1 %v2076_v37  ;;  %v765_v36 = vmul.f32 1.442695, %v719_v21 }
 0x292   :  { %v633_v44 = vpop.f32.mrf.mxu3  ;;  %v672_v49 = vpop.xlane.xlu0 %671 }
 0x293   :  { %v2081_v48 = vadd.f32 %v1903_v58, %v633_v44  ;;  %v720_v52 = vsub.f32 %v1981_v22, %v672_v49 }
 0x295   :  { %699 = vmax.xlane.f32.xlu2 %v2081_v48  ;;  %v767_v0 = vmul.f32 1.442695, %v720_v52 }
 0x299   :  { %v802_v53 = vpop.xlane.xlu2 %801 }
 0x29a   :  { %1530 = vrcp.f32 %v802_v53  ;;  %v636_v56 = vpop.f32.mrf.mxu3  ;;  %v674_v60 = vpop.xlane.xlu1 %673  ;;  %v876_v17 = vand.u32 2147483648, %v802_v53  ;;  %vm870_vm2 = vweird.f32 %v802_v53 }
 0x29b   :  { %v2087_v59 = vadd.f32 %v1903_v58, %v636_v56  ;;  %1532 = vpow2.f32 %v763_v54  ;;  %v721_v5 = vsub.f32 %v1988_v28, %v674_v60  ;;  %v874_v28 = vand.u32 2147483647, %v802_v53 }
 0x29c   :  { %1534 = vpow2.f32 %v767_v0  ;;  %v877_v45 = vor.u32 1.1754944e-38, %v876_v17 }
 0x29d   :  { %701 = vmax.xlane.f32.xlu0 %v2087_v59  ;;  %825 = vadd.xlane.f32.xlu2 %v2089_v62  ;;  %v769_v7 = vmul.f32 1.442695, %v721_v5  ;;  %vm875_vm4 = vcmp.eq.f32.partialorder %v874_v28, 8.507059e+37 }
 0x2a0   :  { %v1531_v22 = vpop.eup %1530 }
 0x2a1   :  { %v866_v3 = vmul.f32 %v1531_v22, %v802_v53  ;;  %v804_v6 = vpop.xlane.xlu0 %803  ;;  %v2098_v55 = vpop.eup %1532  ;;  %vm871_vm1 = vweird.f32 %v1531_v22 }
 0x2a2   :  { %1536 = vrcp.f32 %v804_v6  ;;  %v638_v11 = vpop.f32.mrf.mxu3  ;;  %v2100_v42 = vpop.eup %1534  ;;  %vm872_vm3 = vmor %vm870_vm2, %vm871_vm1  ;;  %v891_v50 = vand.u32 2147483648, %v804_v6  ;;  %v889_v53 = vand.u32 2147483647, %v804_v6  ;;  %vm885_vm6 = vweird.f32 %v804_v6 }
 0x2a3   :  { %v867_v12 = vsub.f32 1.0, %v866_v3  ;;  %v2096_v13 = vadd.f32 %v1903_v58, %v638_v11  ;;  %1538 = vpow2.f32 %v759_v2  ;;  %v676_v34 = vpop.xlane.xlu2 %675 }
 0x2a4   :  { %1540 = vpow2.f32 %v769_v7  ;;  %v892_v0 = vor.u32 1.1754944e-38, %v891_v50  ;;  %vm890_vm8 = vcmp.eq.f32.partialorder %v889_v53, 8.507059e+37 }
 0x2a5   :  { %v868_v18 = vmul.f32 %v1531_v22, %v867_v12  ;;  %703 = vmax.xlane.f32.xlu1 %v2096_v13  ;;  %827 = vadd.xlane.f32.xlu0 %v2098_v55 }
 0x2a6   :  { %831 = vadd.xlane.f32.xlu2 %v2100_v42 }
 0x2a7   :  { %v869_v58 = vadd.f32 %v1531_v22, %v868_v18 }
 0x2a8   :  { %v1537_v23 = vpop.eup %1536 }
 0x2a9   :  { %v873_v61 = vsel %vm872_vm3, %v1531_v22, %v869_v58  ;;  %v881_v29 = vmul.f32 %v1537_v23, %v804_v6  ;;  %v806_v35 = vpop.xlane.xlu1 %805  ;;  %v2106_v44 = vpop.eup %1538  ;;  %vm886_vm5 = vweird.f32 %v1537_v23 }
 0x2aa   :  { %v878_v39 = vsel %vm875_vm4, %v877_v45, %v873_v61  ;;  %1542 = vrcp.f32 %v806_v35  ;;  %v678_v43 = vpop.xlane.xlu0 %677  ;;  %v2110_v49 = vpop.eup %1540  ;;  %vm887_vm7 = vmor %vm885_vm6, %vm886_vm5  ;;  %v906_v6 = vand.u32 2147483648, %v806_v35  ;;  %v904_v28 = vand.u32 2147483647, %v806_v35 }
 0x2ab   :  { %v879_v14 = vmul.f32 %v1985_v25, %v878_v39  ;;  %v882_v41 = vsub.f32 1.0, %v881_v29  ;;  %v723_v47 = vsub.f32 %v2004_v9, %v678_v43  ;;  %1544 = vpow2.f32 %v765_v36 }
 0x2ac   :  { %v722_v25 = vsub.f32 %v1996_v4, %v676_v34  ;;  %vm900_vm10 = vweird.f32 %v806_v35  ;;  %v907_v58 = vor.u32 1.1754944e-38, %v906_v6  ;;  %vm905_vm12 = vcmp.eq.f32.partialorder %v904_v28, 8.507059e+37 }
 0x2ad   :  { %1345 = vst [vmem:[%s2352_s7] sm:$0xff] %v879_v14  ;;  %v883_v52 = vmul.f32 %v1537_v23, %v882_v41  ;;  %v773_v54 = vmul.f32 1.442695, %v723_v47  ;;  %823 = vadd.xlane.f32.xlu1 %v2106_v44  ;;  %833 = vadd.xlane.f32.xlu0 %v2110_v49 }
 0x2ae   :  { %v771_v2 = vmul.f32 1.442695, %v722_v25 }
 0x2af   :  { %v884_v56 = vadd.f32 %v1537_v23, %v883_v52  ;;  %1546 = vpow2.f32 %v773_v54 }
 0x2b0   :  { %v1543_v9 = vpop.eup %1542 }
 0x2b1   :  { %v888_v60 = vsel %vm887_vm7, %v1537_v23, %v884_v56  ;;  %v896_v63 = vmul.f32 %v1543_v9, %v806_v35  ;;  %v808_v5 = vpop.xlane.xlu2 %807  ;;  %v2120_v4 = vpop.eup %1544  ;;  %vm901_vm9 = vweird.f32 %v1543_v9 }
 0x2b2   :  { %v893_v22 = vsel %vm890_vm8, %v892_v0, %v888_v60  ;;  %1548 = vrcp.f32 %v808_v5  ;;  %v680_v3 = vpop.xlane.xlu1 %679  ;;  %vm902_vm11 = vmor %vm900_vm10, %vm901_vm9  ;;  %v921_v41 = vand.u32 2147483648, %v808_v5  ;;  %v919_v50 = vand.u32 2147483647, %v808_v5 }
 0x2b3   :  { %v894_v7 = vmul.f32 %v1993_v32, %v893_v22  ;;  %v897_v11 = vsub.f32 1.0, %v896_v63  ;;  %v724_v12 = vsub.f32 %v2012_v16, %v680_v3  ;;  %1550 = vpow2.f32 %v771_v2 }
 0x2b4   :  { %vm915_vm14 = vweird.f32 %v808_v5  ;;  %v922_v53 = vor.u32 1.1754944e-38, %v921_v41  ;;  %vm920_vm0 = vcmp.eq.f32.partialorder %v919_v50, 8.507059e+37 }
 0x2b5   :  { %v2122_v17 = vpop.eup %1546  ;;  %1346 = vst [vmem:[%s2352_s7 + $0x8] sm:$0xff] %v894_v7  ;;  %v898_v18 = vmul.f32 %v1543_v9, %v897_v11  ;;  %v775_v21 = vmul.f32 1.442695, %v724_v12  ;;  %829 = vadd.xlane.f32.xlu1 %v2120_v4 }
 0x2b6   :  { %837 = vadd.xlane.f32.xlu2 %v2122_v17 }
 0x2b7   :  { %v899_v32 = vadd.f32 %v1543_v9, %v898_v18  ;;  %1552 = vpow2.f32 %v775_v21 }
 0x2b8   :  { %v1549_v16 = vpop.eup %1548 }
 0x2b9   :  { %v903_v23 = vsel %vm902_vm11, %v1543_v9, %v899_v32  ;;  %v911_v45 = vmul.f32 %v1549_v16, %v808_v5  ;;  %v810_v61 = vpop.xlane.xlu0 %809  ;;  %v2131_v14 = vpop.eup %1550  ;;  %vm916_vm13 = vweird.f32 %v1549_v16 }
 0x2ba   :  { %v908_v29 = vsel %vm905_vm12, %v907_v58, %v903_v23  ;;  %1554 = vrcp.f32 %v810_v61  ;;  %v682_v34 = vpop.xlane.xlu2 %681  ;;  %vm917_vm15 = vmor %vm915_vm14, %vm916_vm13  ;;  %v936_v2 = vand.u32 2147483648, %v810_v61  ;;  %v934_v7 = vand.u32 2147483647, %v810_v61 }
 0x2bb   :  { %v909_v36 = vmul.f32 %v2001_v38, %v908_v29  ;;  %v912_v39 = vsub.f32 1.0, %v911_v45  ;;  %v725_v43 = vsub.f32 %v2020_v20, %v682_v34  ;;  %vm930_vm2 = vweird.f32 %v810_v61 }
 0x2bc   :  { %v937_v6 = vor.u32 1.1754944e-38, %v936_v2  ;;  %vm935_vm4 = vcmp.eq.f32.partialorder %v934_v7, 8.507059e+37 }
 0x2bd   :  { %v2133_v35 = vpop.eup %1552  ;;  %1347 = vst [vmem:[%s2352_s7 + $0x10] sm:$0xff] %v909_v36  ;;  %v913_v47 = vmul.f32 %v1549_v16, %v912_v39  ;;  %v777_v52 = vmul.f32 1.442695, %v725_v43  ;;  %835 = vadd.xlane.f32.xlu1 %v2131_v14 }
 0x2be   :  { %839 = vadd.xlane.f32.xlu0 %v2133_v35 }
 0x2bf   :  { %v914_v38 = vadd.f32 %v1549_v16, %v913_v47  ;;  %1556 = vpow2.f32 %v777_v52 }
 0x2c0   :  { %v1555_v20 = vpop.eup %1554 }
 0x2c1   :  { %v918_v54 = vsel %vm917_vm15, %v1549_v16, %v914_v38  ;;  %v926_v25 = vmul.f32 %v1555_v20, %v810_v61  ;;  %v812_v56 = vpop.xlane.xlu1 %811  ;;  %vm931_vm1 = vweird.f32 %v1555_v20 }
 0x2c2   :  { %v923_v9 = vsel %vm920_vm0, %v922_v53, %v918_v54  ;;  %1558 = vrcp.f32 %v812_v56  ;;  %v684_v0 = vpop.xlane.xlu0 %683  ;;  %vm932_vm3 = vmor %vm930_vm2, %vm931_vm1  ;;  %v951_v45 = vand.u32 2147483648, %v812_v56  ;;  %v949_v34 = vand.u32 2147483647, %v812_v56 }
 0x2c3   :  { %v924_v60 = vmul.f32 %v2009_v46, %v923_v9  ;;  %v927_v63 = vsub.f32 1.0, %v926_v25  ;;  %v726_v22 = vsub.f32 %v2028_v27, %v684_v0  ;;  %vm945_vm6 = vweird.f32 %v812_v56 }
 0x2c4   :  { %v952_v43 = vor.u32 1.1754944e-38, %v951_v45  ;;  %vm950_vm8 = vcmp.eq.f32.partialorder %v949_v34, 8.507059e+37 }
 0x2c5   :  { %v2142_v3 = vpop.eup %1556  ;;  %1348 = vst [vmem:[%s2352_s7 + $0x18] sm:$0xff] %v924_v60  ;;  %v928_v5 = vmul.f32 %v1555_v20, %v927_v63  ;;  %v779_v11 = vmul.f32 1.442695, %v726_v22 }
 0x2c6   :  { %841 = vadd.xlane.f32.xlu1 %v2142_v3 }
 0x2c7   :  { %v929_v12 = vadd.f32 %v1555_v20, %v928_v5  ;;  %1560 = vpow2.f32 %v779_v11 }
 0x2c8   :  { %v1559_v46 = vpop.eup %1558 }
 0x2c9   :  { %v933_v27 = vsel %vm932_vm3, %v1555_v20, %v929_v12  ;;  %v941_v18 = vmul.f32 %v1559_v46, %v812_v56  ;;  %v814_v28 = vpop.xlane.xlu2 %813  ;;  %vm946_vm5 = vweird.f32 %v1559_v46 }
 0x2ca   :  { %v938_v21 = vsel %vm935_vm4, %v937_v6, %v933_v27  ;;  %1562 = vrcp.f32 %v814_v28  ;;  %v686_v32 = vpop.xlane.xlu1 %685  ;;  %vm947_vm7 = vmor %vm945_vm6, %vm946_vm5  ;;  %v966_v54 = vand.u32 2147483648, %v814_v28  ;;  %v964_v9 = vand.u32 2147483647, %v814_v28 }
 0x2cb   :  { %v939_v16 = vmul.f32 %v2017_v51, %v938_v21  ;;  %v942_v58 = vsub.f32 1.0, %v941_v18  ;;  %v727_v23 = vsub.f32 %v2036_v30, %v686_v32  ;;  %vm960_vm10 = vweird.f32 %v814_v28 }
 0x2cc   :  { %v967_v63 = vor.u32 1.1754944e-38, %v966_v54  ;;  %vm965_vm12 = vcmp.eq.f32.partialorder %v964_v9, 8.507059e+37 }
 0x2cd   :  { %v2150_v29 = vpop.eup %1560  ;;  %1349 = vst [vmem:[%s2352_s7 + $0x20] sm:$0xff] %v939_v16  ;;  %v943_v61 = vmul.f32 %v1559_v46, %v942_v58  ;;  %v781_v36 = vmul.f32 1.442695, %v727_v23 }
 0x2ce   :  { %843 = vadd.xlane.f32.xlu2 %v2150_v29 }
 0x2cf   :  { %v944_v39 = vadd.f32 %v1559_v46, %v943_v61  ;;  %1564 = vpow2.f32 %v781_v36 }
 0x2d0   :  { %v1563_v51 = vpop.eup %1562 }
 0x2d1   :  { %v948_v30 = vsel %vm947_vm7, %v1559_v46, %v944_v39  ;;  %v956_v41 = vmul.f32 %v1563_v51, %v814_v28  ;;  %v816_v47 = vpop.xlane.xlu0 %815  ;;  %vm961_vm9 = vweird.f32 %v1563_v51 }
 0x2d2   :  { %v953_v50 = vsel %vm950_vm8, %v952_v43, %v948_v30  ;;  %1566 = vrcp.f32 %v816_v47  ;;  %v688_v52 = vpop.xlane.xlu2 %687  ;;  %vm962_vm11 = vmor %vm960_vm10, %vm961_vm9  ;;  %v981_v12 = vand.u32 2147483648, %v816_v47  ;;  %v979_v27 = vand.u32 2147483647, %v816_v47 }
 0x2d3   :  { %v954_v38 = vmul.f32 %v2025_v57, %v953_v50  ;;  %v957_v20 = vsub.f32 1.0, %v956_v41  ;;  %v728_v53 = vsub.f32 %v2044_v33, %v688_v52  ;;  %vm975_vm14 = vweird.f32 %v816_v47 }
 0x2d4   :  { %v982_v21 = vor.u32 1.1754944e-38, %v981_v12  ;;  %vm980_vm0 = vcmp.eq.f32.partialorder %v979_v27, 8.507059e+37 }
 0x2d5   :  { %v2158_v25 = vpop.eup %1564  ;;  %1350 = vst [vmem:[%s2352_s7 + $0x28] sm:$0xff] %v954_v38  ;;  %v958_v56 = vmul.f32 %v1563_v51, %v957_v20  ;;  %v783_v0 = vmul.f32 1.442695, %v728_v53 }
 0x2d6   :  { %845 = vadd.xlane.f32.xlu0 %v2158_v25 }
 0x2d7   :  { %v959_v60 = vadd.f32 %v1563_v51, %v958_v56  ;;  %1568 = vpow2.f32 %v783_v0 }
 0x2d8   :  { %v1567_v57 = vpop.eup %1566 }
 0x2d9   :  { %v963_v33 = vsel %vm962_vm11, %v1563_v51, %v959_v60  ;;  %v971_v22 = vmul.f32 %v1567_v57, %v816_v47  ;;  %v818_v2 = vpop.xlane.xlu1 %817  ;;  %vm976_vm13 = vweird.f32 %v1567_v57 }
 0x2da   :  { %v968_v5 = vsel %vm965_vm12, %v967_v63, %v963_v33  ;;  %1570 = vrcp.f32 %v818_v2  ;;  %vm977_vm15 = vmor %vm975_vm14, %vm976_vm13  ;;  %v996_v39 = vand.u32 2147483648, %v818_v2  ;;  %v994_v43 = vand.u32 2147483647, %v818_v2 }
 0x2db   :  { %v969_v7 = vmul.f32 %v2033_v1, %v968_v5  ;;  %v972_v11 = vsub.f32 1.0, %v971_v22  ;;  %vm990_vm2 = vweird.f32 %v818_v2 }
 0x2dc   :  { %vm995_vm4 = vcmp.eq.f32.partialorder %v994_v43, 8.507059e+37 }
 0x2dd   :  { %v2165_v46 = vpop.eup %1568  ;;  %1351 = vst [vmem:[%s2352_s7 + $0x30] sm:$0xff] %v969_v7  ;;  %v973_v6 = vmul.f32 %v1567_v57, %v972_v11 }
 0x2de   :  { %847 = vadd.xlane.f32.xlu1 %v2165_v46 }
 0x2df   :  { %v974_v18 = vadd.f32 %v1567_v57, %v973_v6 }
 0x2e0   :  { %v1571_v28 = vpop.eup %1570  ;;  %v690_v32 = vpop.xlane.xlu0 %689 }
 0x2e1   :  { %v978_v1 = vsel %vm977_vm15, %v1567_v57, %v974_v18  ;;  %v986_v16 = vmul.f32 %v1571_v28, %v818_v2  ;;  %v729_v58 = vsub.f32 %v2053_v19, %v690_v32  ;;  %v820_v23 = vpop.xlane.xlu2 %819  ;;  %vm991_vm1 = vweird.f32 %v1571_v28 }
 0x2e2   :  { %v983_v45 = vsel %vm980_vm0, %v982_v21, %v978_v1  ;;  %1572 = vrcp.f32 %v820_v23  ;;  %vm992_vm3 = vmor %vm990_vm2, %vm991_vm1  ;;  %v997_v19 = vor.u32 1.1754944e-38, %v996_v39  ;;  %v1011_v0 = vand.u32 2147483648, %v820_v23 }
 0x2e3   :  { %v984_v61 = vmul.f32 %v2041_v10, %v983_v45  ;;  %v987_v34 = vsub.f32 1.0, %v986_v16  ;;  %v785_v36 = vmul.f32 1.442695, %v729_v58  ;;  %v1009_v57 = vand.u32 2147483647, %v820_v23 }
 0x2e4   :  { %vm1005_vm6 = vweird.f32 %v820_v23  ;;  %v1012_v33 = vor.u32 1.1754944e-38, %v1011_v0 }
 0x2e5   :  { %1352 = vst [vmem:[%s2352_s7 + $0x38] sm:$0xff] %v984_v61  ;;  %v988_v51 = vmul.f32 %v1571_v28, %v987_v34  ;;  %1574 = vpow2.f32 %v785_v36  ;;  %vm1010_vm8 = vcmp.eq.f32.partialorder %v1009_v57, 8.507059e+37 }
 0x2e7   :  { %v989_v30 = vadd.f32 %v1571_v28, %v988_v51 }
 0x2e8   :  { %v1573_v41 = vpop.eup %1572  ;;  %v692_v47 = vpop.xlane.xlu1 %691 }
 0x2e9   :  { %v993_v50 = vsel %vm992_vm3, %v1571_v28, %v989_v30  ;;  %v1001_v10 = vmul.f32 %v1573_v41, %v820_v23  ;;  %v730_v52 = vsub.f32 %v2061_v24, %v692_v47  ;;  %v822_v38 = vpop.xlane.xlu0 %821  ;;  %vm1006_vm5 = vweird.f32 %v1573_v41 }
 0x2ea   :  { %v998_v20 = vsel %vm995_vm4, %v997_v19, %v993_v50  ;;  %1576 = vrcp.f32 %v822_v38  ;;  %vm1007_vm7 = vmor %vm1005_vm6, %vm1006_vm5  ;;  %v1026_v18 = vand.u32 2147483648, %v822_v38  ;;  %v1024_v21 = vand.u32 2147483647, %v822_v38 }
 0x2eb   :  { %v2177_v53 = vpop.eup %1574  ;;  %v999_v54 = vmul.f32 %v2049_v15, %v998_v20  ;;  %v1002_v56 = vsub.f32 1.0, %v1001_v10  ;;  %v787_v9 = vmul.f32 1.442695, %v730_v52  ;;  %vm1020_vm10 = vweird.f32 %v822_v38 }
 0x2ec   :  { %849 = vadd.xlane.f32.xlu2 %v2177_v53  ;;  %vm1025_vm12 = vcmp.eq.f32.partialorder %v1024_v21, 8.507059e+37 }
 0x2ed   :  { %1353 = vst [vmem:[%s2352_s7 + $0x40] sm:$0xff] %v999_v54  ;;  %v1003_v60 = vmul.f32 %v1573_v41, %v1002_v56  ;;  %1578 = vpow2.f32 %v787_v9 }
 0x2ef   :  { %v1004_v24 = vadd.f32 %v1573_v41, %v1003_v60 }
 0x2f0   :  { %v1577_v63 = vpop.eup %1576  ;;  %v694_v22 = vpop.xlane.xlu2 %693 }
 0x2f1   :  { %v1008_v15 = vsel %vm1007_vm7, %v1573_v41, %v1004_v24  ;;  %v1016_v2 = vmul.f32 %v1577_v63, %v822_v38  ;;  %v731_v5 = vsub.f32 %v2068_v40, %v694_v22  ;;  %vm1021_vm9 = vweird.f32 %v1577_v63 }
 0x2f2   :  { %v1013_v7 = vsel %vm1010_vm8, %v1012_v33, %v1008_v15  ;;  %vm1022_vm11 = vmor %vm1020_vm10, %vm1021_vm9  ;;  %v1027_v40 = vor.u32 1.1754944e-38, %v1026_v18 }
 0x2f3   :  { %v2185_v11 = vpop.eup %1578  ;;  %v1014_v12 = vmul.f32 %v2056_v8, %v1013_v7  ;;  %v1017_v6 = vsub.f32 1.0, %v1016_v2  ;;  %v789_v27 = vmul.f32 1.442695, %v731_v5 }
 0x2f4   :  { %851 = vadd.xlane.f32.xlu0 %v2185_v11 }
 0x2f5   :  { %1354 = vst [vmem:[%s2352_s7 + $0x48] sm:$0xff] %v1014_v12  ;;  %v1018_v28 = vmul.f32 %v1577_v63, %v1017_v6  ;;  %1580 = vpow2.f32 %v789_v27 }
 0x2f7   :  { %v1019_v32 = vadd.f32 %v1577_v63, %v1018_v28 }
 0x2f8   :  { %v696_v1 = vpop.xlane.xlu0 %695 }
 0x2f9   :  { %v1023_v16 = vsel %vm1022_vm11, %v1577_v63, %v1019_v32  ;;  %v732_v8 = vsub.f32 %v2072_v31, %v696_v1 }
 0x2fa   :  { %v1028_v58 = vsel %vm1025_vm12, %v1027_v40, %v1023_v16 }
 0x2fb   :  { %v2193_v23 = vpop.eup %1580  ;;  %v1029_v45 = vmul.f32 %v2063_v26, %v1028_v58  ;;  %v791_v61 = vmul.f32 1.442695, %v732_v8 }
 0x2fc   :  { %853 = vadd.xlane.f32.xlu1 %v2193_v23 }
 0x2fd   :  { %1355 = vst [vmem:[%s2352_s7 + $0x50] sm:$0xff] %v1029_v45  ;;  %1582 = vpow2.f32 %v791_v61 }
 0x300   :  { %v698_v34 = vpop.xlane.xlu1 %697 }
 0x301   :  { %v733_v36 = vsub.f32 %v2076_v37, %v698_v34 }
 0x303   :  { %v2201_v39 = vpop.eup %1582  ;;  %v793_v51 = vmul.f32 1.442695, %v733_v36 }
 0x304   :  { %855 = vadd.xlane.f32.xlu2 %v2201_v39 }
 0x305   :  { %1584 = vpow2.f32 %v793_v51 }
 0x308   :  { %v700_v31 = vpop.xlane.xlu2 %699 }
 0x309   :  { %v734_v26 = vsub.f32 %v2081_v48, %v700_v31 }
 0x30b   :  { %v2205_v43 = vpop.eup %1584  ;;  %v795_v30 = vmul.f32 1.442695, %v734_v26 }
 0x30c   :  { %857 = vadd.xlane.f32.xlu0 %v2205_v43 }
 0x30d   :  { %1586 = vpow2.f32 %v795_v30 }
 0x310   :  { %v826_v41 = vpop.xlane.xlu2 %825  ;;  %v702_v19 = vpop.xlane.xlu0 %701 }
 0x311   :  { %1588 = vrcp.f32 %v826_v41  ;;  %v735_v37 = vsub.f32 %v2087_v59, %v702_v19  ;;  %v1056_v9 = vand.u32 2147483648, %v826_v41  ;;  %v1054_v57 = vand.u32 2147483647, %v826_v41 }
 0x312   :  { %vm1050_vm14 = vweird.f32 %v826_v41 }
 0x313   :  { %v2209_v47 = vpop.eup %1586  ;;  %v797_v50 = vmul.f32 1.442695, %v735_v37  ;;  %v1057_v33 = vor.u32 1.1754944e-38, %v1056_v9  ;;  %vm1055_vm0 = vcmp.eq.f32.partialorder %v1054_v57, 8.507059e+37 }
 0x314   :  { %859 = vadd.xlane.f32.xlu1 %v2209_v47 }
 0x315   :  { %1590 = vpow2.f32 %v797_v50 }
 0x317   :  { %v1589_v10 = vpop.eup %1588 }
 0x318   :  { %v1046_v52 = vmul.f32 %v1589_v10, %v826_v41  ;;  %v704_v48 = vpop.xlane.xlu1 %703  ;;  %v828_v38 = vpop.xlane.xlu0 %827  ;;  %vm1051_vm13 = vweird.f32 %v1589_v10 }
 0x319   :  { %v736_v20 = vsub.f32 %v2096_v13, %v704_v48  ;;  %v832_v54 = vpop.xlane.xlu2 %831  ;;  %1592 = vrcp.f32 %v828_v38  ;;  %vm1052_vm15 = vmor %vm1050_vm14, %vm1051_vm13  ;;  %v1071_v21 = vand.u32 2147483648, %v828_v38  ;;  %v1069_v1 = vand.u32 2147483647, %v828_v38 }
 0x31a   :  { %v1047_v56 = vsub.f32 1.0, %v1046_v52  ;;  %1594 = vrcp.f32 %v832_v54  ;;  %v1101_v32 = vand.u32 2147483648, %v832_v54  ;;  %vm1065_vm3 = vweird.f32 %v828_v38 }
 0x31b   :  { %v799_v0 = vmul.f32 1.442695, %v736_v20  ;;  %v2213_v60 = vpop.eup %1590  ;;  %vm1095_vm4 = vweird.f32 %v832_v54  ;;  %v1072_v61 = vor.u32 1.1754944e-38, %v1071_v21  ;;  %vm1070_vm7 = vcmp.eq.f32.partialorder %v1069_v1, 8.507059e+37 }
 0x31c   :  { %v1048_v59 = vmul.f32 %v1589_v10, %v1047_v56  ;;  %861 = vadd.xlane.f32.xlu2 %v2213_v60  ;;  %v1102_v34 = vor.u32 1.1754944e-38, %v1101_v32 }
 0x31d   :  { %1596 = vpow2.f32 %v799_v0 }
 0x31e   :  { %v1049_v24 = vadd.f32 %v1589_v10, %v1048_v59 }
 0x31f   :  { %v1593_v63 = vpop.eup %1592 }
 0x320   :  { %v1595_v13 = vpop.eup %1594  ;;  %v1053_v22 = vsel %vm1052_vm15, %v1589_v10, %v1049_v24  ;;  %v1061_v15 = vmul.f32 %v1593_v63, %v828_v38  ;;  %v2216_v2 = vpop.xlane.xlu1 %823  ;;  %vm1066_vm1 = vweird.f32 %v1593_v63 }
 0x321   :  { %v2218_v5 = vpop.xlane.xlu0 %833  ;;  %v1058_v7 = vsel %vm1055_vm0, %v1057_v33, %v1053_v22  ;;  %v1091_v12 = vmul.f32 %v1595_v13, %v832_v54  ;;  %1598 = vrcp.f32 %v2216_v2  ;;  %vm1096_vm2 = vweird.f32 %v1595_v13  ;;  %vm1067_vm5 = vmor %vm1065_vm3, %vm1066_vm1 }
 0x322   :  { %v1059_v6 = vmul.f32 %v2089_v62, %v1058_v7  ;;  %v1062_v27 = vsub.f32 1.0, %v1061_v15  ;;  %1600 = vrcp.f32 %v2218_v5  ;;  %v1099_v62 = vand.u32 2147483647, %v832_v54  ;;  %vm1097_vm6 = vmor %vm1095_vm4, %vm1096_vm2 }
 0x323   :  { %v2222_v18 = vpop.eup %1596  ;;  %v1092_v28 = vsub.f32 1.0, %v1091_v12  ;;  %v1039_v38 = vand.u32 2147483647, %v2216_v2  ;;  %v1041_v20 = vand.u32 2147483648, %v2216_v2  ;;  %vm1035_vm10 = vweird.f32 %v2216_v2 }
 0x324   :  { %1357 = vst [vmem:[%s2352_s7 + $0x60] sm:$0xff] %v1059_v6  ;;  %v1063_v40 = vmul.f32 %v1593_v63, %v1062_v27  ;;  %863 = vadd.xlane.f32.xlu0 %v2222_v18  ;;  %vm1100_vm8 = vcmp.eq.f32.partialorder %v1099_v62, 8.507059e+37  ;;  %v1114_v0 = vand.u32 2147483647, %v2218_v5  ;;  %vm1110_vm13 = vweird.f32 %v2218_v5 }
 0x325   :  { %v1093_v16 = vmul.f32 %v1595_v13, %v1092_v28  ;;  %v1042_v57 = vor.u32 1.1754944e-38, %v1041_v20  ;;  %vm1040_vm14 = vcmp.eq.f32.partialorder %v1039_v38, 8.507059e+37 }
 0x326   :  { %v1064_v8 = vadd.f32 %v1593_v63, %v1063_v40  ;;  %vm1115_vm0 = vcmp.eq.f32.partialorder %v1114_v0, 8.507059e+37 }
 0x327   :  { %v1599_v58 = vpop.eup %1598  ;;  %v1094_v45 = vadd.f32 %v1595_v13, %v1093_v16 }
 0x328   :  { %v1068_v36 = vsel %vm1067_vm5, %v1593_v63, %v1064_v8  ;;  %v1031_v51 = vmul.f32 %v1599_v58, %v2216_v2  ;;  %v2230_v31 = vpop.xlane.xlu1 %829  ;;  %v1601_v26 = vpop.eup %1600  ;;  %vm1036_vm9 = vweird.f32 %v1599_v58 }
 0x329   :  { %v1098_v30 = vsel %vm1097_vm6, %v1595_v13, %v1094_v45  ;;  %v1073_v41 = vsel %vm1070_vm7, %v1072_v61, %v1068_v36  ;;  %1602 = vrcp.f32 %v2230_v31  ;;  %v2233_v19 = vpop.xlane.xlu2 %837  ;;  %v1106_v52 = vmul.f32 %v1601_v26, %v2218_v5  ;;  %vm1037_vm12 = vmor %vm1035_vm10, %vm1036_vm9 }
 0x32a   :  { %v1103_v37 = vsel %vm1100_vm8, %v1102_v34, %v1098_v30  ;;  %v1074_v50 = vmul.f32 %v2098_v55, %v1073_v41  ;;  %v1032_v10 = vsub.f32 1.0, %v1031_v51  ;;  %1604 = vrcp.f32 %v2233_v19 }
 0x32b   :  { %v1104_v48 = vmul.f32 %v2100_v42, %v1103_v37  ;;  %v1107_v56 = vsub.f32 1.0, %v1106_v52  ;;  %v1116_v55 = vand.u32 2147483648, %v2218_v5  ;;  %vm1111_vm11 = vweird.f32 %v1601_v26 }
 0x32c   :  { %1358 = vst [vmem:[%s2352_s7 + $0x68] sm:$0xff] %v1074_v50  ;;  %v1033_v54 = vmul.f32 %v1599_v58, %v1032_v10  ;;  %vm1112_vm15 = vmor %vm1110_vm13, %vm1111_vm11  ;;  %v1084_v28 = vand.u32 2147483647, %v2230_v31  ;;  %v1086_v21 = vand.u32 2147483648, %v2230_v31  ;;  %vm1080_vm2 = vweird.f32 %v2230_v31 }
 0x32d   :  { %1360 = vst [vmem:[%s2352_s7 + $0x78] sm:$0xff] %v1104_v48  ;;  %v1108_v9 = vmul.f32 %v1601_v26, %v1107_v56  ;;  %v1117_v15 = vor.u32 1.1754944e-38, %v1116_v55  ;;  %v1146_v62 = vand.u32 2147483648, %v2233_v19  ;;  %vm1140_vm6 = vweird.f32 %v2233_v19 }
 0x32e   :  { %v1034_v42 = vadd.f32 %v1599_v58, %v1033_v54  ;;  %vm1085_vm5 = vcmp.eq.f32.partialorder %v1084_v28, 8.507059e+37 }
 0x32f   :  { %v1603_v59 = vpop.eup %1602  ;;  %v1109_v63 = vadd.f32 %v1601_v26, %v1108_v9  ;;  %v1147_v41 = vor.u32 1.1754944e-38, %v1146_v62 }
 0x330   :  { %v1038_v24 = vsel %vm1037_vm12, %v1599_v58, %v1034_v42  ;;  %v1076_v33 = vmul.f32 %v1603_v59, %v2230_v31  ;;  %v2252_v13 = vpop.xlane.xlu1 %835  ;;  %v1605_v7 = vpop.eup %1604  ;;  %vm1081_vm1 = vweird.f32 %v1603_v59  ;;  %v1087_v58 = vor.u32 1.1754944e-38, %v1086_v21 }
 0x331   :  { %v1043_v22 = vsel %vm1040_vm14, %v1042_v57, %v1038_v24  ;;  %1606 = vrcp.f32 %v2252_v13  ;;  %v2255_v2 = vpop.xlane.xlu0 %839  ;;  %v1113_v6 = vsel %vm1112_vm15, %v1601_v26, %v1109_v63  ;;  %v1136_v32 = vmul.f32 %v1605_v7, %v2233_v19  ;;  %vm1082_vm3 = vmor %vm1080_vm2, %vm1081_vm1 }
 0x332   :  { %v1044_v12 = vmul.f32 %v2106_v44, %v1043_v22  ;;  %v1077_v5 = vsub.f32 1.0, %v1076_v33  ;;  %v1118_v27 = vsel %vm1115_vm0, %v1117_v15, %v1113_v6  ;;  %1608 = vrcp.f32 %v2255_v2 }
 0x333   :  { %v1119_v40 = vmul.f32 %v2110_v49, %v1118_v27  ;;  %v1137_v44 = vsub.f32 1.0, %v1136_v32  ;;  %vm1141_vm4 = vweird.f32 %v1605_v7  ;;  %v1144_v49 = vand.u32 2147483647, %v2233_v19 }
 0x334   :  { %1356 = vst [vmem:[%s2352_s7 + $0x58] sm:$0xff] %v1044_v12  ;;  %v1078_v1 = vmul.f32 %v1603_v59, %v1077_v5  ;;  %vm1142_vm7 = vmor %vm1140_vm6, %vm1141_vm4  ;;  %v1131_v10 = vand.u32 2147483648, %v2252_v13  ;;  %v1129_v38 = vand.u32 2147483647, %v2252_v13  ;;  %vm1125_vm10 = vweird.f32 %v2252_v13 }
 0x335   :  { %1361 = vst [vmem:[%s2352_s7 + $0x80] sm:$0xff] %v1119_v40  ;;  %v1138_v45 = vmul.f32 %v1605_v7, %v1137_v44  ;;  %vm1145_vm8 = vcmp.eq.f32.partialorder %v1144_v49, 8.507059e+37  ;;  %v1161_v56 = vand.u32 2147483648, %v2255_v2  ;;  %v1159_v9 = vand.u32 2147483647, %v2255_v2 }
 0x336   :  { %v1079_v16 = vadd.f32 %v1603_v59, %v1078_v1  ;;  %v1132_v55 = vor.u32 1.1754944e-38, %v1131_v10  ;;  %vm1130_vm13 = vcmp.eq.f32.partialorder %v1129_v38, 8.507059e+37  ;;  %vm1155_vm14 = vweird.f32 %v2255_v2 }
 0x337   :  { %v1607_v8 = vpop.eup %1606  ;;  %v1139_v51 = vadd.f32 %v1605_v7, %v1138_v45  ;;  %vm1160_vm0 = vcmp.eq.f32.partialorder %v1159_v9, 8.507059e+37 }
 0x338   :  { %v1083_v61 = vsel %vm1082_vm3, %v1603_v59, %v1079_v16  ;;  %v1121_v34 = vmul.f32 %v1607_v8, %v2252_v13  ;;  %v1609_v30 = vpop.eup %1608  ;;  %vm1126_vm9 = vweird.f32 %v1607_v8  ;;  %v1162_v13 = vor.u32 1.1754944e-38, %v1161_v56 }
 0x339   :  { %v1088_v36 = vsel %vm1085_vm5, %v1087_v58, %v1083_v61  ;;  %v842_v26 = vpop.xlane.xlu1 %841  ;;  %v1143_v50 = vsel %vm1142_vm7, %v1605_v7, %v1139_v51  ;;  %v1151_v52 = vmul.f32 %v1609_v30, %v2255_v2  ;;  %vm1127_vm11 = vmor %vm1125_vm10, %vm1126_vm9  ;;  %vm1156_vm12 = vweird.f32 %v1609_v30 }
 0x33a   :  { %v1089_v31 = vmul.f32 %v2120_v4, %v1088_v36  ;;  %v1122_v37 = vsub.f32 1.0, %v1121_v34  ;;  %1610 = vrcp.f32 %v842_v26  ;;  %v1148_v48 = vsel %vm1145_vm8, %v1147_v41, %v1143_v50  ;;  %vm1157_vm15 = vmor %vm1155_vm14, %vm1156_vm12 }
 0x33b   :  { %v1149_v4 = vmul.f32 %v2122_v17, %v1148_v48  ;;  %v1152_v20 = vsub.f32 1.0, %v1151_v52  ;;  %v1176_v12 = vand.u32 2147483648, %v842_v26  ;;  %v1174_v2 = vand.u32 2147483647, %v842_v26 }
 0x33c   :  { %1359 = vst [vmem:[%s2352_s7 + $0x70] sm:$0xff] %v1089_v31  ;;  %v1123_v19 = vmul.f32 %v1607_v8, %v1122_v37  ;;  %vm1170_vm2 = vweird.f32 %v842_v26 }
 0x33d   :  { %1363 = vst [vmem:[%s2352_s7 + $0x90] sm:$0xff] %v1149_v4  ;;  %v1153_v42 = vmul.f32 %v1609_v30, %v1152_v20  ;;  %v1177_v28 = vor.u32 1.1754944e-38, %v1176_v12  ;;  %vm1175_vm4 = vcmp.eq.f32.partialorder %v1174_v2, 8.507059e+37 }
 0x33e   :  { %v1124_v54 = vadd.f32 %v1607_v8, %v1123_v19 }
 0x33f   :  { %v1154_v57 = vadd.f32 %v1609_v30, %v1153_v42 }
 0x340   :  { %v1611_v0 = vpop.eup %1610  ;;  %v1128_v59 = vsel %vm1127_vm11, %v1607_v8, %v1124_v54 }
 0x341   :  { %v1133_v17 = vsel %vm1130_vm13, %v1132_v55, %v1128_v59  ;;  %v1166_v24 = vmul.f32 %v1611_v0, %v842_v26  ;;  %v844_v63 = vpop.xlane.xlu2 %843  ;;  %v1158_v22 = vsel %vm1157_vm15, %v1609_v30, %v1154_v57  ;;  %vm1171_vm1 = vweird.f32 %v1611_v0 }
 0x342   :  { %v1134_v33 = vmul.f32 %v2131_v14, %v1133_v17  ;;  %1612 = vrcp.f32 %v844_v63  ;;  %v1163_v7 = vsel %vm1160_vm0, %v1162_v13, %v1158_v22  ;;  %vm1172_vm3 = vmor %vm1170_vm2, %vm1171_vm1  ;;  %v1191_v16 = vand.u32 2147483648, %v844_v63 }
 0x343   :  { %v1167_v15 = vsub.f32 1.0, %v1166_v24  ;;  %v1164_v6 = vmul.f32 %v2133_v35, %v1163_v7  ;;  %v1189_v8 = vand.u32 2147483647, %v844_v63  ;;  %vm1185_vm6 = vweird.f32 %v844_v63 }
 0x344   :  { %1362 = vst [vmem:[%s2352_s7 + $0x88] sm:$0xff] %v1134_v33  ;;  %v1192_v49 = vor.u32 1.1754944e-38, %v1191_v16 }
 0x345   :  { %v1168_v5 = vmul.f32 %v1611_v0, %v1167_v15  ;;  %1364 = vst [vmem:[%s2352_s7 + $0x98] sm:$0xff] %v1164_v6  ;;  %vm1190_vm8 = vcmp.eq.f32.partialorder %v1189_v8, 8.507059e+37 }
 0x347   :  { %v1169_v14 = vadd.f32 %v1611_v0, %v1168_v5 }
 0x348   :  { %v1613_v27 = vpop.eup %1612 }
 0x349   :  { %v1173_v21 = vsel %vm1172_vm3, %v1611_v0, %v1169_v14  ;;  %v1181_v32 = vmul.f32 %v1613_v27, %v844_v63  ;;  %v846_v40 = vpop.xlane.xlu0 %845  ;;  %vm1186_vm5 = vweird.f32 %v1613_v27 }
 0x34a   :  { %v1178_v1 = vsel %vm1175_vm4, %v1177_v28, %v1173_v21  ;;  %1614 = vrcp.f32 %v846_v40  ;;  %vm1187_vm7 = vmor %vm1185_vm6, %vm1186_vm5  ;;  %v1206_v30 = vand.u32 2147483648, %v846_v40  ;;  %v1204_v41 = vand.u32 2147483647, %v846_v40 }
 0x34b   :  { %v1179_v35 = vmul.f32 %v2142_v3, %v1178_v1  ;;  %v1182_v44 = vsub.f32 1.0, %v1181_v32  ;;  %vm1200_vm10 = vweird.f32 %v846_v40 }
 0x34c   :  { %v1207_v10 = vor.u32 1.1754944e-38, %v1206_v30  ;;  %vm1205_vm12 = vcmp.eq.f32.partialorder %v1204_v41, 8.507059e+37 }
 0x34d   :  { %1365 = vst [vmem:[%s2352_s7 + $0xa0] sm:$0xff] %v1179_v35  ;;  %v1183_v62 = vmul.f32 %v1613_v27, %v1182_v44 }
 0x34f   :  { %v1184_v58 = vadd.f32 %v1613_v27, %v1183_v62 }
 0x350   :  { %v1615_v45 = vpop.eup %1614 }
 0x351   :  { %v1188_v61 = vsel %vm1187_vm7, %v1613_v27, %v1184_v58  ;;  %v1196_v34 = vmul.f32 %v1615_v45, %v846_v40  ;;  %v848_v36 = vpop.xlane.xlu1 %847  ;;  %vm1201_vm9 = vweird.f32 %v1615_v45 }
 0x352   :  { %v1193_v51 = vsel %vm1190_vm8, %v1192_v49, %v1188_v61  ;;  %1616 = vrcp.f32 %v848_v36  ;;  %vm1202_vm11 = vmor %vm1200_vm10, %vm1201_vm9  ;;  %v1221_v4 = vand.u32 2147483648, %v848_v36  ;;  %v1219_v54 = vand.u32 2147483647, %v848_v36 }
 0x353   :  { %v1194_v3 = vmul.f32 %v2150_v29, %v1193_v51  ;;  %v1197_v26 = vsub.f32 1.0, %v1196_v34  ;;  %vm1215_vm14 = vweird.f32 %v848_v36 }
 0x354   :  { %v1222_v42 = vor.u32 1.1754944e-38, %v1221_v4  ;;  %vm1220_vm0 = vcmp.eq.f32.partialorder %v1219_v54, 8.507059e+37 }
 0x355   :  { %1366 = vst [vmem:[%s2352_s7 + $0xa8] sm:$0xff] %v1194_v3  ;;  %v1198_v31 = vmul.f32 %v1615_v45, %v1197_v26 }
 0x357   :  { %v1199_v37 = vadd.f32 %v1615_v45, %v1198_v31 }
 0x358   :  { %v1617_v50 = vpop.eup %1616 }
 0x359   :  { %v1203_v52 = vsel %vm1202_vm11, %v1615_v45, %v1199_v37  ;;  %v1211_v48 = vmul.f32 %v1617_v50, %v848_v36  ;;  %vm1216_vm13 = vweird.f32 %v1617_v50 }
 0x35a   :  { %v1208_v19 = vsel %vm1205_vm12, %v1207_v10, %v1203_v52  ;;  %vm1217_vm15 = vmor %vm1215_vm14, %vm1216_vm13 }
 0x35b   :  { %v1209_v29 = vmul.f32 %v2158_v25, %v1208_v19  ;;  %v1212_v38 = vsub.f32 1.0, %v1211_v48 }
 0x35d   :  { %1367 = vst [vmem:[%s2352_s7 + $0xb0] sm:$0xff] %v1209_v29  ;;  %v1213_v20 = vmul.f32 %v1617_v50, %v1212_v38 }
 0x35f   :  { %v1214_v56 = vadd.f32 %v1617_v50, %v1213_v20  ;;  %v850_v55 = vpop.xlane.xlu2 %849 }
 0x360   :  { %1618 = vrcp.f32 %v850_v55  ;;  %v1236_v63 = vand.u32 2147483648, %v850_v55  ;;  %v1234_v13 = vand.u32 2147483647, %v850_v55  ;;  %vm1230_vm2 = vweird.f32 %v850_v55 }
 0x361   :  { %v1218_v9 = vsel %vm1217_vm15, %v1617_v50, %v1214_v56 }
 0x362   :  { %v1223_v0 = vsel %vm1220_vm0, %v1222_v42, %v1218_v9  ;;  %v1237_v7 = vor.u32 1.1754944e-38, %v1236_v63  ;;  %vm1235_vm4 = vcmp.eq.f32.partialorder %v1234_v13, 8.507059e+37 }
 0x363   :  { %v1224_v25 = vmul.f32 %v2165_v46, %v1223_v0 }
 0x365   :  { %1368 = vst [vmem:[%s2352_s7 + $0xb8] sm:$0xff] %v1224_v25 }
 0x366   :  { %v1619_v59 = vpop.eup %1618 }
 0x367   :  { %v1226_v17 = vmul.f32 %v1619_v59, %v850_v55  ;;  %v852_v57 = vpop.xlane.xlu0 %851  ;;  %vm1231_vm1 = vweird.f32 %v1619_v59 }
 0x368   :  { %1620 = vrcp.f32 %v852_v57  ;;  %vm1232_vm3 = vmor %vm1230_vm2, %vm1231_vm1  ;;  %v1251_v27 = vand.u32 2147483648, %v852_v57  ;;  %v1249_v21 = vand.u32 2147483647, %v852_v57  ;;  %vm1245_vm6 = vweird.f32 %v852_v57 }
 0x369   :  { %v1227_v24 = vsub.f32 1.0, %v1226_v17 }
 0x36a   :  { %v1252_v1 = vor.u32 1.1754944e-38, %v1251_v27  ;;  %vm1250_vm8 = vcmp.eq.f32.partialorder %v1249_v21, 8.507059e+37 }
 0x36b   :  { %v1228_v33 = vmul.f32 %v1619_v59, %v1227_v24 }
 0x36d   :  { %v1229_v22 = vadd.f32 %v1619_v59, %v1228_v33 }
 0x36e   :  { %v1621_v15 = vpop.eup %1620 }
 0x36f   :  { %v1233_v12 = vsel %vm1232_vm3, %v1619_v59, %v1229_v22  ;;  %v1241_v46 = vmul.f32 %v1621_v15, %v852_v57  ;;  %v854_v6 = vpop.xlane.xlu1 %853  ;;  %vm1246_vm5 = vweird.f32 %v1621_v15 }
 0x370   :  { %v1238_v5 = vsel %vm1235_vm4, %v1237_v7, %v1233_v12  ;;  %1622 = vrcp.f32 %v854_v6  ;;  %vm1247_vm7 = vmor %vm1245_vm6, %vm1246_vm5  ;;  %v1266_v58 = vand.u32 2147483648, %v854_v6  ;;  %v1264_v49 = vand.u32 2147483647, %v854_v6 }
 0x371   :  { %v1239_v2 = vmul.f32 %v2177_v53, %v1238_v5  ;;  %v1242_v14 = vsub.f32 1.0, %v1241_v46  ;;  %vm1260_vm10 = vweird.f32 %v854_v6 }
 0x372   :  { %v1267_v36 = vor.u32 1.1754944e-38, %v1266_v58  ;;  %vm1265_vm12 = vcmp.eq.f32.partialorder %v1264_v49, 8.507059e+37 }
 0x373   :  { %1369 = vst [vmem:[%s2352_s7 + $0xc0] sm:$0xff] %v1239_v2  ;;  %v1243_v28 = vmul.f32 %v1621_v15, %v1242_v14 }
 0x375   :  { %v1244_v32 = vadd.f32 %v1621_v15, %v1243_v28 }
 0x376   :  { %v1623_v40 = vpop.eup %1622 }
 0x377   :  { %v1248_v35 = vsel %vm1247_vm7, %v1621_v15, %v1244_v32  ;;  %v1256_v44 = vmul.f32 %v1623_v40, %v854_v6  ;;  %v856_v16 = vpop.xlane.xlu2 %855  ;;  %vm1261_vm9 = vweird.f32 %v1623_v40 }
 0x378   :  { %v1253_v62 = vsel %vm1250_vm8, %v1252_v1, %v1248_v35  ;;  %1624 = vrcp.f32 %v856_v16  ;;  %vm1262_vm11 = vmor %vm1260_vm10, %vm1261_vm9  ;;  %v1281_v41 = vand.u32 2147483648, %v856_v16  ;;  %v1279_v50 = vand.u32 2147483647, %v856_v16 }
 0x379   :  { %v1254_v53 = vmul.f32 %v2185_v11, %v1253_v62  ;;  %v1257_v8 = vsub.f32 1.0, %v1256_v44  ;;  %vm1275_vm14 = vweird.f32 %v856_v16 }
 0x37a   :  { %v1282_v48 = vor.u32 1.1754944e-38, %v1281_v41  ;;  %vm1280_vm0 = vcmp.eq.f32.partialorder %v1279_v50, 8.507059e+37 }
 0x37b   :  { %1370 = vst [vmem:[%s2352_s7 + $0xc8] sm:$0xff] %v1254_v53  ;;  %v1258_v45 = vmul.f32 %v1623_v40, %v1257_v8 }
 0x37d   :  { %v1259_v61 = vadd.f32 %v1623_v40, %v1258_v45 }
 0x37e   :  { %v1625_v34 = vpop.eup %1624 }
 0x37f   :  { %v1263_v51 = vsel %vm1262_vm11, %v1623_v40, %v1259_v61  ;;  %v1271_v3 = vmul.f32 %v1625_v34, %v856_v16  ;;  %v858_v26 = vpop.xlane.xlu0 %857  ;;  %vm1276_vm13 = vweird.f32 %v1625_v34 }
 0x380   :  { %v1268_v30 = vsel %vm1265_vm12, %v1267_v36, %v1263_v51  ;;  %1626 = vrcp.f32 %v858_v26  ;;  %vm1277_vm15 = vmor %vm1275_vm14, %vm1276_vm13  ;;  %v1296_v54 = vand.u32 2147483648, %v858_v26  ;;  %v1294_v55 = vand.u32 2147483647, %v858_v26 }
 0x381   :  { %v1269_v11 = vmul.f32 %v2193_v23, %v1268_v30  ;;  %v1272_v31 = vsub.f32 1.0, %v1271_v3  ;;  %vm1290_vm2 = vweird.f32 %v858_v26 }
 0x382   :  { %v1297_v0 = vor.u32 1.1754944e-38, %v1296_v54  ;;  %vm1295_vm4 = vcmp.eq.f32.partialorder %v1294_v55, 8.507059e+37 }
 0x383   :  { %1371 = vst [vmem:[%s2352_s7 + $0xd0] sm:$0xff] %v1269_v11  ;;  %v1273_v37 = vmul.f32 %v1625_v34, %v1272_v31 }
 0x385   :  { %v1274_v10 = vadd.f32 %v1625_v34, %v1273_v37 }
 0x386   :  { %v1627_v52 = vpop.eup %1626 }
 0x387   :  { %v1278_v19 = vsel %vm1277_vm15, %v1625_v34, %v1274_v10  ;;  %v1286_v29 = vmul.f32 %v1627_v52, %v858_v26  ;;  %v860_v38 = vpop.xlane.xlu1 %859  ;;  %vm1291_vm1 = vweird.f32 %v1627_v52 }
 0x388   :  { %v1283_v4 = vsel %vm1280_vm0, %v1282_v48, %v1278_v19  ;;  %1628 = vrcp.f32 %v860_v38  ;;  %vm1292_vm3 = vmor %vm1290_vm2, %vm1291_vm1  ;;  %v1311_v63 = vand.u32 2147483648, %v860_v38  ;;  %v1309_v13 = vand.u32 2147483647, %v860_v38 }
 0x389   :  { %v1284_v23 = vmul.f32 %v2201_v39, %v1283_v4  ;;  %v1287_v20 = vsub.f32 1.0, %v1286_v29  ;;  %vm1305_vm6 = vweird.f32 %v860_v38 }
 0x38a   :  { %v1312_v15 = vor.u32 1.1754944e-38, %v1311_v63  ;;  %vm1310_vm8 = vcmp.eq.f32.partialorder %v1309_v13, 8.507059e+37 }
 0x38b   :  { %1372 = vst [vmem:[%s2352_s7 + $0xd8] sm:$0xff] %v1284_v23  ;;  %v1288_v56 = vmul.f32 %v1627_v52, %v1287_v20 }
 0x38d   :  { %v1289_v42 = vadd.f32 %v1627_v52, %v1288_v56 }
 0x38e   :  { %v1629_v9 = vpop.eup %1628 }
 0x38f   :  { %v1293_v25 = vsel %vm1292_vm3, %v1627_v52, %v1289_v42  ;;  %v1301_v59 = vmul.f32 %v1629_v9, %v860_v38  ;;  %v862_v57 = vpop.xlane.xlu2 %861  ;;  %vm1306_vm5 = vweird.f32 %v1629_v9 }
 0x390   :  { %v1298_v17 = vsel %vm1295_vm4, %v1297_v0, %v1293_v25  ;;  %1630 = vrcp.f32 %v862_v57  ;;  %vm1307_vm7 = vmor %vm1305_vm6, %vm1306_vm5  ;;  %v1326_v14 = vand.u32 2147483648, %v862_v57  ;;  %v1324_v28 = vand.u32 2147483647, %v862_v57 }
 0x391   :  { %v1299_v39 = vmul.f32 %v2205_v43, %v1298_v17  ;;  %v1302_v24 = vsub.f32 1.0, %v1301_v59  ;;  %vm1320_vm10 = vweird.f32 %v862_v57 }
 0x392   :  { %v1327_v40 = vor.u32 1.1754944e-38, %v1326_v14  ;;  %vm1325_vm12 = vcmp.eq.f32.partialorder %v1324_v28, 8.507059e+37 }
 0x393   :  { %1373 = vst [vmem:[%s2352_s7 + $0xe0] sm:$0xff] %v1299_v39  ;;  %v1303_v33 = vmul.f32 %v1629_v9, %v1302_v24 }
 0x395   :  { %v1304_v22 = vadd.f32 %v1629_v9, %v1303_v33 }
 0x396   :  { %v1631_v7 = vpop.eup %1630 }
 0x397   :  { %v1308_v12 = vsel %vm1307_vm7, %v1629_v9, %v1304_v22  ;;  %v864_v46 = vpop.xlane.xlu0 %863  ;;  %v1316_v43 = vmul.f32 %v1631_v7, %v862_v57  ;;  %vm1321_vm9 = vweird.f32 %v1631_v7 }
 0x398   :  { %v1313_v6 = vsel %vm1310_vm8, %v1312_v15, %v1308_v12  ;;  %1632 = vrcp.f32 %v864_v46  ;;  %vm1322_vm11 = vmor %vm1320_vm10, %vm1321_vm9  ;;  %v1341_v62 = vand.u32 2147483648, %v864_v46  ;;  %v1339_v8 = vand.u32 2147483647, %v864_v46 }
 0x399   :  { %v1314_v5 = vmul.f32 %v2209_v47, %v1313_v6  ;;  %v1317_v2 = vsub.f32 1.0, %v1316_v43  ;;  %vm1335_vm14 = vweird.f32 %v864_v46 }
 0x39a   :  { %v1342_v45 = vor.u32 1.1754944e-38, %v1341_v62  ;;  %vm1340_vm0 = vcmp.eq.f32.partialorder %v1339_v8, 8.507059e+37 }
 0x39b   :  { %1374 = vst [vmem:[%s2352_s7 + $0xe8] sm:$0xff] %v1314_v5  ;;  %v1318_v27 = vmul.f32 %v1631_v7, %v1317_v2 }
 0x39d   :  { %v1319_v32 = vadd.f32 %v1631_v7, %v1318_v27 }
 0x39e   :  { %v1633_v21 = vpop.eup %1632 }
 0x39f   :  { %v1331_v1 = vmul.f32 %v1633_v21, %v864_v46  ;;  %v1323_v35 = vsel %vm1322_vm11, %v1631_v7, %v1319_v32  ;;  %vm1336_vm13 = vweird.f32 %v1633_v21 }
 0x3a0   :  { %v1328_v44 = vsel %vm1325_vm12, %v1327_v40, %v1323_v35  ;;  %vm1337_vm15 = vmor %vm1335_vm14, %vm1336_vm13 }
 0x3a1   :  { %v1332_v16 = vsub.f32 1.0, %v1331_v1  ;;  %v1329_v47 = vmul.f32 %v2213_v60, %v1328_v44 }
 0x3a3   :  { %v1333_v53 = vmul.f32 %v1633_v21, %v1332_v16  ;;  %1375 = vst [vmem:[%s2352_s7 + $0xf0] sm:$0xff] %v1329_v47 }
 0x3a5   :  { %v1334_v58 = vadd.f32 %v1633_v21, %v1333_v53 }
 0x3a7   :  { %v1338_v49 = vsel %vm1337_vm15, %v1633_v21, %v1334_v58 }
 0x3a8   :  { %v1343_v61 = vsel %vm1340_vm0, %v1342_v45, %v1338_v49 }
 0x3a9   :  { %v1344_v34 = vmul.f32 %v2222_v18, %v1343_v61 }
 0x3ab   :  { %1376 = vst [vmem:[%s2352_s7 + $0xf8] sm:$0xff] %v1344_v34 }

</bundles_post_ra>
